<compile_context>
chip_gen: v7x
topology: tpu7x:2x2x1
jax: 0.10.0
libtpu: 0.0.40
codegen_flags: <defaults>
</compile_context>

<pallas_src>
import functools

import jax
import jax.numpy as jnp
from jax.experimental import pallas as pl
from jax.experimental.pallas import tpu as pltpu

_LANES = 128


def _im2col_conv_relu(xp_ref, w, r0, *, TH, W, Cin, K):
    """conv(KxK, stride 1) + ReLU for TH output rows starting at r0.

    Folds all K*K taps into ONE MXU matmul via an in-register im2col.

    xp_ref : (1, H+2p, W+2p, Cin) zero-padded input block (VMEM ref)
    w      : (K*K*Cin, Cpad)      flattened conv weights (value, lane-dense)
    returns: (TH*W, Cpad) f32     ReLU(conv) for the row block
    """
    cols = []
    for kh in range(K):                                   # static -> unrolled
        rows = xp_ref[0, pl.ds(r0 + kh, TH), :, :]        # (TH, W+2p, Cin)
        for kw in range(K):
            cols.append(rows[:, kw:kw + W, :].reshape(TH * W, Cin))
    patches = jnp.concatenate(cols, axis=-1)              # (TH*W, K*K*Cin)
    # TODO(synk): cast patches/w to bf16 (keep f32 accumulation) on v6e/v7x
    # when the surrounding model tolerates it; kept f32 to match f32 reference.
    acc = jnp.dot(patches, w, preferred_element_type=jnp.float32)
    return jnp.maximum(acc, 0.0)                          # ReLU before BN


def _stats_kernel(xp_ref, w_ref, stats_ref, *, H, W, Cin, Cpad, K, TH):
    """Phase 1: per-image BN partials of ReLU(conv(x)) -- no y written to HBM.

    stats_ref : (1, 2, Cpad)   row 0 = sum over (H, W), row 1 = sum of squares
    """
    w = w_ref[...]                                         # (K*K*Cin, Cpad)
    nb = H // TH

    def row_block(rb, carry):
        s, ss = carry
        r0 = pl.multiple_of(rb * TH, TH)
        y = _im2col_conv_relu(xp_ref, w, r0, TH=TH, W=W, Cin=Cin, K=K)
        s = s + jnp.sum(y, axis=0, keepdims=True)
        ss = ss + jnp.sum(y * y, axis=0, keepdims=True)
        return s, ss

    zero = jnp.zeros((1, Cpad), jnp.float32)
    s, ss = jax.lax.fori_loop(0, nb, row_block, (zero, zero))
    stats_ref[0] = jnp.concatenate([s, ss], axis=0)        # one merged store


def _bn_apply_kernel(xp_ref, w_ref, scale_ref, shift_ref, out_ref,
                     *, H, W, Cin, Cout, K, TH):
    """Phase 2: recompute conv+ReLU, apply precomputed y*scale+shift, store
    only the real Cout channels (packed (H*W, Cout) layout, no channel pad)."""
    w = w_ref[...]                                         # (K*K*Cin, Cpad)
    scale = scale_ref[...]                                 # (1, Cpad)
    shift = shift_ref[...]                                 # (1, Cpad)
    nb = H // TH

    def row_block(rb, _):
        r0 = pl.multiple_of(rb * TH, TH)
        y = _im2col_conv_relu(xp_ref, w, r0, TH=TH, W=W, Cin=Cin, K=K)
        z = y * scale + shift                              # (TH*W, Cpad)
        o0 = pl.multiple_of(rb * (TH * W), TH * W)
        out_ref[0, pl.ds(o0, TH * W), :] = z[:, :Cout]     # real channels only
        return 0

    jax.lax.fori_loop(0, nb, row_block, 0)


def conv_with_activation(x_nchw, w_oihw, gamma, beta, eps=1e-5):
    """Forward pass of ConvWithActivation. Inputs/weights in PyTorch layouts."""
    N, Cin, H, W = x_nchw.shape
    Cout, Cin2, KH, KW = w_oihw.shape
    assert Cin == Cin2 and KH == KW
    K = KH
    pad = 1                                   # nn.Conv2d(..., padding=1)
    Ho = H + 2 * pad - K + 1
    Wo = W + 2 * pad - K + 1
    Cpad = pl.cdiv(Cout, _LANES) * _LANES     # lane-dense compute width
    Hp, Wp = H + 2 * pad, W + 2 * pad
    TH = 8 if Ho % 8 == 0 else Ho             # row-block tile
    assert Ho % TH == 0

    # ---- layout glue (outside the kernels) --------------------------------
    # TODO(synk): keep the surrounding model in NHWC to drop these transposes.
    x_nhwc = jnp.transpose(x_nchw, (0, 2, 3, 1)).astype(jnp.float32)
    xp = jnp.pad(x_nhwc, ((0, 0), (pad, pad), (pad, pad), (0, 0)))  # tiny halo
    # TODO(synk): for large inputs build the halo in VMEM (per-tile) instead of
    # a padded HBM copy, and flatten (W*Cin) to keep the copy lane-dense.
    w_khwc = jnp.transpose(w_oihw, (2, 3, 1, 0)).astype(jnp.float32)  # (K,K,Cin,Cout)
    w_p = jnp.zeros((K * K * Cin, Cpad), jnp.float32).at[:, :Cout].set(
        w_khwc.reshape(K * K * Cin, Cout))

    cparams = pltpu.CompilerParams(
        dimension_semantics=("parallel",),           # megacore sharding on v7x
        vmem_limit_bytes=32 * 1024 * 1024,           # safe on v7x's 64 MiB VMEM
        # TODO(synk): on v5e/v6e (128 MiB VMEM) raise this and use larger row
        # tiles / a spatial grid axis for big H,W.
    )

    # ---- phase 1: per-image BN partial stats (no y intermediate) ----------
    kern1 = functools.partial(_stats_kernel, H=Ho, W=Wo, Cin=Cin, Cpad=Cpad,
                              K=K, TH=TH)
    stats = pl.pallas_call(
        kern1,
        grid=(N,),
        in_specs=[
            pl.BlockSpec((1, Hp, Wp, Cin), lambda n: (n, 0, 0, 0)),
            pl.BlockSpec((K * K * Cin, Cpad), lambda n: (0, 0)),
        ],
        out_specs=pl.BlockSpec((1, 2, Cpad), lambda n: (n, 0, 0)),
        out_shape=jax.ShapeDtypeStruct((N, 2, Cpad), jnp.float32),
        compiler_params=cparams,
    )(xp, w_p)

    # ---- tiny hoisted BN reduction (pure JAX, (N,2,Cpad) -> (1,Cpad)) -----
    count = float(N * Ho * Wo)
    tot = jnp.sum(stats, axis=0)                           # (2, Cpad)
    mean = tot[0] / count
    # NOTE: E[y^2]-E[y]^2 in f32; fine at these counts, see review concern.
    var = jnp.maximum(tot[1] / count - mean * mean, 0.0)   # biased variance
    inv = jax.lax.rsqrt(var + eps)
    g_p = jnp.zeros((Cpad,), jnp.float32).at[:Cout].set(gamma.astype(jnp.float32))
    b_p = jnp.zeros((Cpad,), jnp.float32).at[:Cout].set(beta.astype(jnp.float32))
    scale = (g_p * inv).reshape(1, Cpad)
    shift = (b_p - mean * g_p * inv).reshape(1, Cpad)
    # TODO(synk): BatchNorm running_mean/running_var are not updated (forward
    # output of a training-mode module only).

    # ---- phase 2: recompute conv+ReLU, normalize, write real-width output -
    kern2 = functools.partial(_bn_apply_kernel, H=Ho, W=Wo, Cin=Cin, Cout=Cout,
                              K=K, TH=TH)
    out_flat = pl.pallas_call(
        kern2,
        grid=(N,),
        in_specs=[
            pl.BlockSpec((1, Hp, Wp, Cin), lambda n: (n, 0, 0, 0)),
            pl.BlockSpec((K * K * Cin, Cpad), lambda n: (0, 0)),
            pl.BlockSpec((1, Cpad), lambda n: (0, 0)),
            pl.BlockSpec((1, Cpad), lambda n: (0, 0)),
        ],
        out_specs=pl.BlockSpec((1, Ho * Wo, Cout), lambda n: (n, 0, 0)),
        out_shape=jax.ShapeDtypeStruct((N, Ho * Wo, Cout), jnp.float32),
        compiler_params=cparams,
    )(xp, w_p, scale, shift)

    # Un-flatten spatial, return PyTorch NCHW layout.
    # TODO(synk): drop this transpose if the surrounding model consumes NHWC.
    out_nhwc = out_flat.reshape(N, Ho, Wo, Cout)
    return jnp.transpose(out_nhwc, (0, 3, 1, 2))


def _reference(x, w, gamma, beta, eps=1e-5):
    """Pure-JAX reference matching the PyTorch forward (training-mode BN)."""
    y = jax.lax.conv_general_dilated(
        x, w, window_strides=(1, 1), padding=((1, 1), (1, 1)),
        dimension_numbers=("NCHW", "OIHW", "NCHW"))
    y = jnp.maximum(y, 0.0)
    mean = jnp.mean(y, axis=(0, 2, 3), keepdims=True)
    var = jnp.mean((y - mean) ** 2, axis=(0, 2, 3), keepdims=True)
    return ((y - mean) * jax.lax.rsqrt(var + eps)
            * gamma.reshape(1, -1, 1, 1) + beta.reshape(1, -1, 1, 1))


if __name__ == "__main__":
    # Small, deterministic problem: in_channels=4, out_channels=8, kernel_size=3
    N, Cin, H, W = 2, 4, 16, 16
    Cout, K = 8, 3

    key = jax.random.PRNGKey(0)
    kx, kw, kg, kb = jax.random.split(key, 4)
    x = jax.random.normal(kx, (N, Cin, H, W), dtype=jnp.float32)
    w = 0.1 * jax.random.normal(kw, (Cout, Cin, K, K), dtype=jnp.float32)
    # Non-trivial affine params to exercise the BN scale/shift path.
    gamma = 1.0 + 0.1 * jax.random.normal(kg, (Cout,), dtype=jnp.float32)
    beta = 0.1 * jax.random.normal(kb, (Cout,), dtype=jnp.float32)

    fwd = jax.jit(conv_with_activation)
    out = jax.block_until_ready(fwd(x, w, gamma, beta))
    ref = jax.block_until_ready(_reference(x, w, gamma, beta))

    assert out.shape == (N, Cout, H, W), out.shape
    max_err = float(jnp.max(jnp.abs(out - ref)))
    assert jnp.allclose(out, ref, atol=1e-3, rtol=1e-3), max_err

    print("KERNEL_OK")
</pallas_src>

<mosaic_0001>
module attributes {stable_mosaic.version = 11 : i64} {
  func.func @_stats_kernel(%arg0: i32, %arg1: memref<1x18x18x4xf32, #tpu.memory_space<vmem>>, %arg2: memref<36x128xf32, #tpu.memory_space<vmem>>, %arg3: memref<1x2x128xf32, #tpu.memory_space<vmem>>) attributes {dimension_semantics = [#tpu.dimension_semantics<parallel>], iteration_bounds = array<i64: 2>, scalar_prefetch = 0 : i64, scratch_operands = 0 : i64, tpu.core_type = #tpu.core_type<tc>, window_params = [{transform_indices = @transform_0, window_bounds = array<i64: 1, 18, 18, 4>}, {pipeline_mode = #tpu.pipeline_mode<synchronous>, transform_indices = @transform_1, window_bounds = array<i64: 36, 128>}, {transform_indices = @transform_2, window_bounds = array<i64: 1, 2, 128>}]} {
    %c0 = arith.constant 0 : index
    %c0_0 = arith.constant 0 : index
    %0 = vector.load %arg2[%c0, %c0_0] : memref<36x128xf32, #tpu.memory_space<vmem>>, vector<36x128xf32>
    %cst = arith.constant 0.000000e+00 : f32
    %1 = vector.broadcast %cst : f32 to vector<1x128xf32>
    %c0_i32 = arith.constant 0 : i32
    %c2_i32 = arith.constant 2 : i32
    %2 = arith.addi %c0_i32, %c2_i32 : i32
    %c1_i32 = arith.constant 1 : i32
    %3:2 = scf.for %arg4 = %c0_i32 to %2 step %c1_i32 iter_args(%arg5 = %1, %arg6 = %1) -> (vector<1x128xf32>, vector<1x128xf32>)  : i32 {
      %c8_i32 = arith.constant 8 : i32
      %8 = arith.muli %arg4, %c8_i32 : i32
      %9 = tpu.assume_multiple %8, 8 : i32
      %c0_i32_5 = arith.constant 0 : i32
      %10 = arith.addi %9, %c0_i32_5 : i32
      %c0_6 = arith.constant 0 : index
      %11 = arith.index_cast %10 : i32 to index
      %c0_7 = arith.constant 0 : index
      %c0_8 = arith.constant 0 : index
      %12 = vector.load %arg1[%c0_6, %11, %c0_7, %c0_8] : memref<1x18x18x4xf32, #tpu.memory_space<vmem>>, vector<1x8x18x4xf32>
      %13 = vector.shape_cast %12 : vector<1x8x18x4xf32> to vector<8x18x4xf32>
      %14 = vector.extract_strided_slice %13 {offsets = [0, 0, 0], sizes = [8, 16, 4], strides = [1, 1, 1]} : vector<8x18x4xf32> to vector<8x16x4xf32>
      %15 = vector.shape_cast %14 : vector<8x16x4xf32> to vector<128x4xf32>
      %16 = vector.extract_strided_slice %13 {offsets = [0, 1, 0], sizes = [8, 16, 4], strides = [1, 1, 1]} : vector<8x18x4xf32> to vector<8x16x4xf32>
      %17 = vector.shape_cast %16 : vector<8x16x4xf32> to vector<128x4xf32>
      %18 = vector.extract_strided_slice %13 {offsets = [0, 2, 0], sizes = [8, 16, 4], strides = [1, 1, 1]} : vector<8x18x4xf32> to vector<8x16x4xf32>
      %19 = vector.shape_cast %18 : vector<8x16x4xf32> to vector<128x4xf32>
      %c1_i32_9 = arith.constant 1 : i32
      %20 = arith.addi %9, %c1_i32_9 : i32
      %c0_10 = arith.constant 0 : index
      %21 = arith.index_cast %20 : i32 to index
      %c0_11 = arith.constant 0 : index
      %c0_12 = arith.constant 0 : index
      %22 = vector.load %arg1[%c0_10, %21, %c0_11, %c0_12] : memref<1x18x18x4xf32, #tpu.memory_space<vmem>>, vector<1x8x18x4xf32>
      %23 = vector.shape_cast %22 : vector<1x8x18x4xf32> to vector<8x18x4xf32>
      %24 = vector.extract_strided_slice %23 {offsets = [0, 0, 0], sizes = [8, 16, 4], strides = [1, 1, 1]} : vector<8x18x4xf32> to vector<8x16x4xf32>
      %25 = vector.shape_cast %24 : vector<8x16x4xf32> to vector<128x4xf32>
      %26 = vector.extract_strided_slice %23 {offsets = [0, 1, 0], sizes = [8, 16, 4], strides = [1, 1, 1]} : vector<8x18x4xf32> to vector<8x16x4xf32>
      %27 = vector.shape_cast %26 : vector<8x16x4xf32> to vector<128x4xf32>
      %28 = vector.extract_strided_slice %23 {offsets = [0, 2, 0], sizes = [8, 16, 4], strides = [1, 1, 1]} : vector<8x18x4xf32> to vector<8x16x4xf32>
      %29 = vector.shape_cast %28 : vector<8x16x4xf32> to vector<128x4xf32>
      %c2_i32_13 = arith.constant 2 : i32
      %30 = arith.addi %9, %c2_i32_13 : i32
      %c0_14 = arith.constant 0 : index
      %31 = arith.index_cast %30 : i32 to index
      %c0_15 = arith.constant 0 : index
      %c0_16 = arith.constant 0 : index
      %32 = vector.load %arg1[%c0_14, %31, %c0_15, %c0_16] : memref<1x18x18x4xf32, #tpu.memory_space<vmem>>, vector<1x8x18x4xf32>
      %33 = vector.shape_cast %32 : vector<1x8x18x4xf32> to vector<8x18x4xf32>
      %34 = vector.extract_strided_slice %33 {offsets = [0, 0, 0], sizes = [8, 16, 4], strides = [1, 1, 1]} : vector<8x18x4xf32> to vector<8x16x4xf32>
      %35 = vector.shape_cast %34 : vector<8x16x4xf32> to vector<128x4xf32>
      %36 = vector.extract_strided_slice %33 {offsets = [0, 1, 0], sizes = [8, 16, 4], strides = [1, 1, 1]} : vector<8x18x4xf32> to vector<8x16x4xf32>
      %37 = vector.shape_cast %36 : vector<8x16x4xf32> to vector<128x4xf32>
      %38 = vector.extract_strided_slice %33 {offsets = [0, 2, 0], sizes = [8, 16, 4], strides = [1, 1, 1]} : vector<8x18x4xf32> to vector<8x16x4xf32>
      %39 = vector.shape_cast %38 : vector<8x16x4xf32> to vector<128x4xf32>
      %40 = tpu.concatenate %15, %17, %19, %25, %27, %29, %35, %37, %39 in 1 : vector<128x4xf32>, vector<128x4xf32>, vector<128x4xf32>, vector<128x4xf32>, vector<128x4xf32>, vector<128x4xf32>, vector<128x4xf32>, vector<128x4xf32>, vector<128x4xf32> -> vector<128x36xf32>
      %cst_17 = arith.constant dense<0.000000e+00> : vector<128x128xf32>
      %41 = tpu.matmul %40, %0, %cst_17 {dimension_numbers = #tpu.dot_dimension_numbers<[1], [0], [0], [1], [0, 0, 1, 1], [], []>} : vector<128x36xf32>, vector<36x128xf32>, vector<128x128xf32> -> vector<128x128xf32>
      %cst_18 = arith.constant 0.000000e+00 : f32
      %42 = vector.broadcast %cst_18 : f32 to vector<128x128xf32>
      %43 = arith.maximumf %41, %42 : vector<128x128xf32>
      %cst_19 = arith.constant dense<0.000000e+00> : vector<128xf32>
      %44 = vector.multi_reduction <add>, %43, %cst_19 [0] : vector<128x128xf32> to vector<128xf32>
      %45 = vector.shape_cast %44 : vector<128xf32> to vector<1x128xf32>
      %46 = arith.addf %arg5, %45 : vector<1x128xf32>
      %47 = arith.mulf %43, %43 : vector<128x128xf32>
      %cst_20 = arith.constant dense<0.000000e+00> : vector<128xf32>
      %48 = vector.multi_reduction <add>, %47, %cst_20 [0] : vector<128x128xf32> to vector<128xf32>
      %49 = vector.shape_cast %48 : vector<128xf32> to vector<1x128xf32>
      %50 = arith.addf %arg6, %49 : vector<1x128xf32>
      scf.yield %46, %50 : vector<1x128xf32>, vector<1x128xf32>
    }
    %c2_i32_1 = arith.constant 2 : i32
    %4 = tpu.concatenate %3#0, %3#1 in 0 : vector<1x128xf32>, vector<1x128xf32> -> vector<2x128xf32>
    %c0_2 = arith.constant 0 : index
    %c0_3 = arith.constant 0 : index
    %c0_4 = arith.constant 0 : index
    %5 = vector.load %arg3[%c0_2, %c0_3, %c0_4] : memref<1x2x128xf32, #tpu.memory_space<vmem>>, vector<1x2x128xf32>
    %6 = vector.shape_cast %5 : vector<1x2x128xf32> to vector<2x128xf32>
    %7 = vector.shape_cast %4 : vector<2x128xf32> to vector<1x2x128xf32>
    tpu.vector_store %arg3[%c0_2, %c0_3, %c0_4], %7 {strides = array<i32>} : memref<1x2x128xf32, #tpu.memory_space<vmem>>, vector<1x2x128xf32>,
    return
  }
  func.func @transform_0(%arg0: i32) -> (i32, i32, i32, i32) {
    %c0_i32 = arith.constant 0 : i32
    %c0_i32_0 = arith.constant 0 : i32
    %c0_i32_1 = arith.constant 0 : i32
    %c0_i32_2 = arith.constant 0 : i32
    return %arg0, %c0_i32, %c0_i32_0, %c0_i32_1 : i32, i32, i32, i32
  }
  func.func @transform_1(%arg0: i32) -> (i32, i32) {
    %c0_i32 = arith.constant 0 : i32
    %c0_i32_0 = arith.constant 0 : i32
    %c0_i32_1 = arith.constant 0 : i32
    return %c0_i32, %c0_i32_0 : i32, i32
  }
  func.func @transform_2(%arg0: i32) -> (i32, i32, i32) {
    %c0_i32 = arith.constant 0 : i32
    %c0_i32_0 = arith.constant 0 : i32
    %c0_i32_1 = arith.constant 0 : i32
    return %arg0, %c0_i32, %c0_i32_0 : i32, i32, i32
  }
}

module attributes {stable_mosaic.version = 11 : i64} {
  func.func @_bn_apply_kernel(%arg0: i32, %arg1: memref<1x18x18x4xf32, #tpu.memory_space<vmem>>, %arg2: memref<36x128xf32, #tpu.memory_space<vmem>>, %arg3: memref<1x128xf32, #tpu.memory_space<vmem>>, %arg4: memref<1x128xf32, #tpu.memory_space<vmem>>, %arg5: memref<1x256x8xf32, #tpu.memory_space<vmem>>) attributes {dimension_semantics = [#tpu.dimension_semantics<parallel>], iteration_bounds = array<i64: 2>, scalar_prefetch = 0 : i64, scratch_operands = 0 : i64, tpu.core_type = #tpu.core_type<tc>, window_params = [{transform_indices = @transform_0, window_bounds = array<i64: 1, 18, 18, 4>}, {pipeline_mode = #tpu.pipeline_mode<synchronous>, transform_indices = @transform_1, window_bounds = array<i64: 36, 128>}, {pipeline_mode = #tpu.pipeline_mode<synchronous>, transform_indices = @transform_2, window_bounds = array<i64: 1, 128>}, {pipeline_mode = #tpu.pipeline_mode<synchronous>, transform_indices = @transform_3, window_bounds = array<i64: 1, 128>}, {transform_indices = @transform_4, window_bounds = array<i64: 1, 256, 8>}]} {
    %c0 = arith.constant 0 : index
    %c0_0 = arith.constant 0 : index
    %0 = vector.load %arg2[%c0, %c0_0] : memref<36x128xf32, #tpu.memory_space<vmem>>, vector<36x128xf32>
    %c0_1 = arith.constant 0 : index
    %c0_2 = arith.constant 0 : index
    %1 = vector.load %arg3[%c0_1, %c0_2] : memref<1x128xf32, #tpu.memory_space<vmem>>, vector<1x128xf32>
    %c0_3 = arith.constant 0 : index
    %c0_4 = arith.constant 0 : index
    %2 = vector.load %arg4[%c0_3, %c0_4] : memref<1x128xf32, #tpu.memory_space<vmem>>, vector<1x128xf32>
    %c0_i32 = arith.constant 0 : i32
    %c2_i32 = arith.constant 2 : i32
    %3 = arith.addi %c0_i32, %c2_i32 : i32
    %c1_i32 = arith.constant 1 : i32
    scf.for %arg6 = %c0_i32 to %3 step %c1_i32  : i32 {
      %c8_i32 = arith.constant 8 : i32
      %4 = arith.muli %arg6, %c8_i32 : i32
      %5 = tpu.assume_multiple %4, 8 : i32
      %c0_i32_6 = arith.constant 0 : i32
      %6 = arith.addi %5, %c0_i32_6 : i32
      %c0_7 = arith.constant 0 : index
      %7 = arith.index_cast %6 : i32 to index
      %c0_8 = arith.constant 0 : index
      %c0_9 = arith.constant 0 : index
      %8 = vector.load %arg1[%c0_7, %7, %c0_8, %c0_9] : memref<1x18x18x4xf32, #tpu.memory_space<vmem>>, vector<1x8x18x4xf32>
      %9 = vector.shape_cast %8 : vector<1x8x18x4xf32> to vector<8x18x4xf32>
      %10 = vector.extract_strided_slice %9 {offsets = [0, 0, 0], sizes = [8, 16, 4], strides = [1, 1, 1]} : vector<8x18x4xf32> to vector<8x16x4xf32>
      %11 = vector.shape_cast %10 : vector<8x16x4xf32> to vector<128x4xf32>
      %12 = vector.extract_strided_slice %9 {offsets = [0, 1, 0], sizes = [8, 16, 4], strides = [1, 1, 1]} : vector<8x18x4xf32> to vector<8x16x4xf32>
      %13 = vector.shape_cast %12 : vector<8x16x4xf32> to vector<128x4xf32>
      %14 = vector.extract_strided_slice %9 {offsets = [0, 2, 0], sizes = [8, 16, 4], strides = [1, 1, 1]} : vector<8x18x4xf32> to vector<8x16x4xf32>
      %15 = vector.shape_cast %14 : vector<8x16x4xf32> to vector<128x4xf32>
      %c1_i32_10 = arith.constant 1 : i32
      %16 = arith.addi %5, %c1_i32_10 : i32
      %c0_11 = arith.constant 0 : index
      %17 = arith.index_cast %16 : i32 to index
      %c0_12 = arith.constant 0 : index
      %c0_13 = arith.constant 0 : index
      %18 = vector.load %arg1[%c0_11, %17, %c0_12, %c0_13] : memref<1x18x18x4xf32, #tpu.memory_space<vmem>>, vector<1x8x18x4xf32>
      %19 = vector.shape_cast %18 : vector<1x8x18x4xf32> to vector<8x18x4xf32>
      %20 = vector.extract_strided_slice %19 {offsets = [0, 0, 0], sizes = [8, 16, 4], strides = [1, 1, 1]} : vector<8x18x4xf32> to vector<8x16x4xf32>
      %21 = vector.shape_cast %20 : vector<8x16x4xf32> to vector<128x4xf32>
      %22 = vector.extract_strided_slice %19 {offsets = [0, 1, 0], sizes = [8, 16, 4], strides = [1, 1, 1]} : vector<8x18x4xf32> to vector<8x16x4xf32>
      %23 = vector.shape_cast %22 : vector<8x16x4xf32> to vector<128x4xf32>
      %24 = vector.extract_strided_slice %19 {offsets = [0, 2, 0], sizes = [8, 16, 4], strides = [1, 1, 1]} : vector<8x18x4xf32> to vector<8x16x4xf32>
      %25 = vector.shape_cast %24 : vector<8x16x4xf32> to vector<128x4xf32>
      %c2_i32_14 = arith.constant 2 : i32
      %26 = arith.addi %5, %c2_i32_14 : i32
      %c0_15 = arith.constant 0 : index
      %27 = arith.index_cast %26 : i32 to index
      %c0_16 = arith.constant 0 : index
      %c0_17 = arith.constant 0 : index
      %28 = vector.load %arg1[%c0_15, %27, %c0_16, %c0_17] : memref<1x18x18x4xf32, #tpu.memory_space<vmem>>, vector<1x8x18x4xf32>
      %29 = vector.shape_cast %28 : vector<1x8x18x4xf32> to vector<8x18x4xf32>
      %30 = vector.extract_strided_slice %29 {offsets = [0, 0, 0], sizes = [8, 16, 4], strides = [1, 1, 1]} : vector<8x18x4xf32> to vector<8x16x4xf32>
      %31 = vector.shape_cast %30 : vector<8x16x4xf32> to vector<128x4xf32>
      %32 = vector.extract_strided_slice %29 {offsets = [0, 1, 0], sizes = [8, 16, 4], strides = [1, 1, 1]} : vector<8x18x4xf32> to vector<8x16x4xf32>
      %33 = vector.shape_cast %32 : vector<8x16x4xf32> to vector<128x4xf32>
      %34 = vector.extract_strided_slice %29 {offsets = [0, 2, 0], sizes = [8, 16, 4], strides = [1, 1, 1]} : vector<8x18x4xf32> to vector<8x16x4xf32>
      %35 = vector.shape_cast %34 : vector<8x16x4xf32> to vector<128x4xf32>
      %36 = tpu.concatenate %11, %13, %15, %21, %23, %25, %31, %33, %35 in 1 : vector<128x4xf32>, vector<128x4xf32>, vector<128x4xf32>, vector<128x4xf32>, vector<128x4xf32>, vector<128x4xf32>, vector<128x4xf32>, vector<128x4xf32>, vector<128x4xf32> -> vector<128x36xf32>
      %cst = arith.constant dense<0.000000e+00> : vector<128x128xf32>
      %37 = tpu.matmul %36, %0, %cst {dimension_numbers = #tpu.dot_dimension_numbers<[1], [0], [0], [1], [0, 0, 1, 1], [], []>} : vector<128x36xf32>, vector<36x128xf32>, vector<128x128xf32> -> vector<128x128xf32>
      %cst_18 = arith.constant 0.000000e+00 : f32
      %38 = vector.broadcast %cst_18 : f32 to vector<128x128xf32>
      %39 = arith.maximumf %37, %38 : vector<128x128xf32>
      %40 = vector.broadcast %1 : vector<1x128xf32> to vector<128x128xf32>
      %41 = arith.mulf %39, %40 : vector<128x128xf32>
      %42 = vector.broadcast %2 : vector<1x128xf32> to vector<128x128xf32>
      %43 = arith.addf %41, %42 : vector<128x128xf32>
      %c128_i32 = arith.constant 128 : i32
      %44 = arith.muli %arg6, %c128_i32 : i32
      %45 = tpu.assume_multiple %44, 128 : i32
      %46 = vector.extract_strided_slice %43 {offsets = [0, 0], sizes = [128, 8], strides = [1, 1]} : vector<128x128xf32> to vector<128x8xf32>
      %c0_19 = arith.constant 0 : index
      %47 = arith.index_cast %45 : i32 to index
      %c0_20 = arith.constant 0 : index
      %48 = vector.load %arg5[%c0_19, %47, %c0_20] : memref<1x256x8xf32, #tpu.memory_space<vmem>>, vector<1x128x8xf32>
      %49 = vector.shape_cast %48 : vector<1x128x8xf32> to vector<128x8xf32>
      %50 = vector.shape_cast %46 : vector<128x8xf32> to vector<1x128x8xf32>
      tpu.vector_store %arg5[%c0_19, %47, %c0_20], %50 {strides = array<i32>} : memref<1x256x8xf32, #tpu.memory_space<vmem>>, vector<1x128x8xf32>,
    }
    %c2_i32_5 = arith.constant 2 : i32
    return
  }
  func.func @transform_0(%arg0: i32) -> (i32, i32, i32, i32) {
    %c0_i32 = arith.constant 0 : i32
    %c0_i32_0 = arith.constant 0 : i32
    %c0_i32_1 = arith.constant 0 : i32
    %c0_i32_2 = arith.constant 0 : i32
    return %arg0, %c0_i32, %c0_i32_0, %c0_i32_1 : i32, i32, i32, i32
  }
  func.func @transform_1(%arg0: i32) -> (i32, i32) {
    %c0_i32 = arith.constant 0 : i32
    %c0_i32_0 = arith.constant 0 : i32
    %c0_i32_1 = arith.constant 0 : i32
    return %c0_i32, %c0_i32_0 : i32, i32
  }
  func.func @transform_2(%arg0: i32) -> (i32, i32) {
    %c0_i32 = arith.constant 0 : i32
    %c0_i32_0 = arith.constant 0 : i32
    %c0_i32_1 = arith.constant 0 : i32
    return %c0_i32, %c0_i32_0 : i32, i32
  }
  func.func @transform_3(%arg0: i32) -> (i32, i32) {
    %c0_i32 = arith.constant 0 : i32
    %c0_i32_0 = arith.constant 0 : i32
    %c0_i32_1 = arith.constant 0 : i32
    return %c0_i32, %c0_i32_0 : i32, i32
  }
  func.func @transform_4(%arg0: i32) -> (i32, i32, i32) {
    %c0_i32 = arith.constant 0 : i32
    %c0_i32_0 = arith.constant 0 : i32
    %c0_i32_1 = arith.constant 0 : i32
    return %arg0, %c0_i32, %c0_i32_0 : i32, i32, i32
  }
}

</mosaic_0001>

<bundles_post_ra>
// kernel: conv_with_activation.2
= control target key start
LH: loop header
LB: loop body
LE: loop exit
PB: predicated region body
PF: predicated region fallthrough
CT: control target
= control target key end

     0   :  { %s1666_s9 = smov 0   ;;  %s2335_s0 = inlined_call_operand.vmem [shape: f32[2,18,18,4], index: 0, kind: input, shape index: {}]   ;;  %s2336_s1 = inlined_call_operand.vmem [shape: f32[36,128], index: 1, kind: input, shape index: {}]   ;;  %s2337_s2 = inlined_call_operand.vmem [shape: f32[2,2,128], index: 2, kind: output, shape index: {}]  }
   0x1 LB: > { %s1421_s10 = sadd.s32 4294967295, %s1629_s9   ;;  %p1425_p0 = scmp.ge.s32.totalorder %s1629_s9, 1  ;;  %s1629_s9 = sphi %s1666_s9, %s12_s9  }
   0x2   : > { %p112_p1 = scmp.lt.s32.totalorder %s1629_s9, 3 }
   0x4   : > { %p113_p2 = pnand %p1425_p0, %p112_p1 }
   0x5   : > { %p133_p3 = scmp.lt.s32.totalorder (!%p113_p2), %s1421_s10, 1  ;;  %v1677_v0 = vld [vmem:[%s2336_s1] sm:$0xff] (!%p113_p2)  ;;  %v1682_v1 = vld [vmem:[%s2336_s1 + $0x8] sm:$0xff] (!%p113_p2)  ;;  %v1687_v2 = vld [vmem:[%s2336_s1 + $0x10] sm:$0xff] (!%p113_p2)  ;;  %v1709_v5 = vmov (!%p113_p2), 0.0   ;;  %v1711_v6 = vmov (!%p113_p2), 0.0  }
   0x6   : > { %116 = sbr.rel (%p113_p2) target bundleno = 627 (0x273), region = 28  ;;  %v1692_v3 = vld [vmem:[%s2336_s1 + $0x18] sm:$0xff] (!%p113_p2)  ;;  %v1697_v4 = vld [vmem:[%s2336_s1 + $0x20] sm:$0xf] (!%p113_p2)  ;;  %s1713_s29 = smov (!%p113_p2), 0  }
   0xd   : > { %s2341_s10 = smov (!%p133_p3, %s1421_s10), 1 }
   0xe   : > { %s1570_s21 = smul.u32 432, %s2341_s10  ;;  %s1427_s22 = sshll.u32 %s2341_s10, 1 }
   0xf   : > { %s1702_s25 = scalar_lea.vmem %s2337_s2, %s1427_s22 }
  0x10   : > { %s1707_s28 = scalar_lea.vmem %s2335_s0, %s1570_s21 }
  0x11 LB: >> { %s1429_s30 = smul.u32 192, %s1641_s29  ;;  %s1643_s4 = smov 12   ;;  %vm247_vm0 = vcmask 1045504   ;;  %vm206_vm1 = vcmask 1046528   ;;  %v1556_v39 = vpack.c.bf16 %v1682_v1, %v1677_v0  ;;  %v1560_v44 = vpack.c.bf16 %v1692_v3, %v1687_v2  ;;  %s1641_s29 = sphi %s1713_s29, %s152_s29   ;;  %v1637_v6 = vphi %v1711_v6, %v2339_v6   ;;  %v1633_v5 = vphi %v1709_v5, %v2338_v5  }
  0x12   : >> { %s1644_s5 = smov 8   ;;  %s1645_s6 = smov 4   ;;  %vm1119_vm2 = vcmask 1043456   ;;  %vm934_vm3 = vcmask 31744   ;;  %vm951_vm4 = vcmask 64512   ;;  %vm968_vm5 = vcmask 97280  }
  0x13   : >> { %s1726_s3 = scalar_lea.vmem %s1707_s28, %s1429_s30  ;;  %s1646_s7 = smov 16   ;;  %1557 = vmatprep.subr.bf16.mxu0 %v1556_v39  ;;  %1564 = vmatprep.subr.bf16.mxu1 %v1556_v39  ;;  %vm985_vm6 = vcmask 130048   ;;  %vm1002_vm7 = vcmask 162816   ;;  %vm1019_vm8 = vcmask 195584   ;;  %vm1036_vm9 = vcmask 228352  }
  0x14   : >> { %v1729_v7 = vld [vmem:[%s1726_s3 + $0x20] sm:$0xff]  ;;  %v1732_v8 = vld [vmem:[%s1726_s3 + $0x18] sm:$0xff]  ;;  %v1742_v10 = vld [vmem:[%s1726_s3 + $0x8] sm:$0xff]  ;;  %s1647_s8 = smov 20   ;;  %s1648_s10 = smov 24   ;;  %1559 = vmatpush3.bf16.msra.mxu0 %v1556_v39  ;;  %1567 = vmatpush3.bf16.msra.mxu1 %v1556_v39  ;;  %vm1053_vm10 = vcmask 261120  }
  0x15   : >> { %v1735_v9 = vld [vmem:[%s1726_s3] sm:$0xff]  ;;  %648 = vrot.lane.b32.xlu1 %v1729_v7, %s1643_s4  ;;  %646 = vrot.lane.b32.xlu0 %v1732_v8, %s1643_s4  ;;  %v249_v12 = vrot.slane %v1742_v10, 2  ;;  %v208_v14 = vrot.slane %v1742_v10, 1  ;;  %v160_v15 = vld [vmem:[%s1726_s3 + $0x10] sm:$0x3]  ;;  %v340_v20 = vrot.slane %v1729_v7, 1 }
  0x16   : >> { %v248_v11 = vrot.slane %v1735_v9, 2  ;;  %v207_v13 = vrot.slane %v1735_v9, 1  ;;  %v251_v16 = vrot.slane %v160_v15, 2  ;;  %v210_v17 = vrot.slane %v160_v15, 1  ;;  %v1434_v24 = vld [vmem:[%s1726_s3 + $0x28] sm:$0x3]  ;;  %1561 = vmatprep.subr.bf16.mxu0 %v1560_v44  ;;  %1565 = vmatprep.subr.bf16.mxu1 %v1560_v44 }
  0x17   : >> { %v339_v21 = vrot.slane %v1732_v8, 1  ;;  %v380_v25 = vrot.slane %v1729_v7, 2  ;;  %v379_v26 = vrot.slane %v1732_v8, 2  ;;  %v342_v28 = vrot.slane %v1434_v24, 1  ;;  %v163_v29 = vld [vmem:[%s1726_s3 + $0x28] sm:$0x3] }
  0x18   : >> { %v250_v18 = vsel %vm247_vm0, %v248_v11, %v249_v12  ;;  %v209_v19 = vsel %vm206_vm1, %v207_v13, %v208_v14  ;;  %v252_v22 = vsel %vm247_vm0, %v249_v12, %v251_v16  ;;  %v211_v23 = vsel %vm206_vm1, %v208_v14, %v210_v17  ;;  %v1774_v35 = vld [vmem:[%s1726_s3 + $0x30] sm:$0xff]  ;;  %v1778_v38 = vld [vmem:[%s1726_s3 + $0x38] sm:$0xff]  ;;  %v1460_v45 = vld [vmem:[%s1726_s3 + $0x40] sm:$0x3]  ;;  %s1649_s11 = smov 28   ;;  %1563 = vmatpush3.bf16.msra.mxu0 %v1560_v44  ;;  %s1650_s12 = smov 32  }
  0x19   : >> { %598 = vrot.lane.b32.xlu1 %v250_v18, %s1644_s5  ;;  %550 = vrot.lane.b32.xlu0 %v209_v19, %s1645_s6  ;;  %v214_v27 = vsel %vm206_vm1, %v339_v21, %v340_v20  ;;  %v381_v30 = vsel %vm247_vm0, %v379_v26, %v380_v25  ;;  %v343_v31 = vsel %vm206_vm1, %v340_v20, %v342_v28  ;;  %v215_v32 = vrot.slane %v163_v29, 1  ;;  %v1437_v49 = vld [vmem:[%s1726_s3 + $0x40] sm:$0x3]  ;;  %v1823_v60 = vld [vmem:[%s1726_s3 + $0x48] sm:$0xff]  ;;  %s152_s29 = sadd.s32 1, %s1641_s29  }
  0x1a   : >> { %v382_v34 = vrot.slane %v1434_v24, 2  ;;  %v256_v37 = vrot.slane %v163_v29, 2  ;;  %v470_v40 = vrot.slane %v1774_v35, 1  ;;  %v471_v42 = vrot.slane %v1778_v38, 1  ;;  %1568 = vmatpush3.bf16.msra.mxu1 %v1560_v44  ;;  %1530 = vmatprep.subr.msk.mxu0 %vm1119_vm2, %v1697_v4  ;;  %v166_v55 = vld [vmem:[%s1726_s3 + $0x40] sm:$0x3] }
  0x1b   : >> { %v216_v33 = vsel %vm206_vm1, %v340_v20, %v215_v32  ;;  %v510_v46 = vrot.slane %v1774_v35, 2  ;;  %v511_v47 = vrot.slane %v1778_v38, 2  ;;  %v473_v48 = vrot.slane %v1460_v45, 1  ;;  %1566 = vmatprep.subr.msk.mxu1 %vm1119_vm2, %v1697_v4  ;;  %v1827_v63 = vld [vmem:[%s1726_s3 + $0x50] sm:$0xff]  ;;  %v1463_v15 = vld [vmem:[%s1726_s3 + $0x58] sm:$0x3] }
  0x1c   : >> { %v383_v36 = vsel %vm247_vm0, %v380_v25, %v382_v34  ;;  %v257_v41 = vsel %vm247_vm0, %v380_v25, %v256_v37  ;;  %v472_v43 = vsel %vm206_vm1, %v470_v40, %v471_v42  ;;  %v347_v52 = vrot.slane %v1437_v49, 1  ;;  %1531 = vmatpush3.msk.msra.mxu0 %vm1119_vm2, %v1697_v4  ;;  %v1440_v19 = vld [vmem:[%s1726_s3 + $0x58] sm:$0x3]  ;;  %v1466_v40 = vld [vmem:[%s1726_s3 + $0x70] sm:$0x3]  ;;  %p149_p4 = scmp.ge.s32.totalorder %s152_s29, 2  }
  0x1d   : >> { %600 = vrot.lane.b32.xlu1 %v252_v22, %s1644_s5  ;;  %552 = vrot.lane.b32.xlu0 %v211_v23, %s1645_s6  ;;  %v512_v50 = vsel %vm247_vm0, %v510_v46, %v511_v47  ;;  %v474_v51 = vsel %vm206_vm1, %v471_v42, %v473_v48  ;;  %v513_v54 = vrot.slane %v1460_v45, 2  ;;  %v220_v57 = vrot.slane %v166_v55, 1  ;;  %v169_v25 = vld [vmem:[%s1726_s3 + $0x58] sm:$0x3]  ;;  %v1443_v44 = vld [vmem:[%s1726_s3 + $0x70] sm:$0x3] }
  0x1e   : >> { %1569 = vmatpush3.msk.msra.mxu1 %vm1119_vm2, %v1697_v4  ;;  %v348_v53 = vsel %vm206_vm1, %v471_v42, %v347_v52  ;;  %v387_v59 = vrot.slane %v1437_v49, 2  ;;  %v261_v62 = vrot.slane %v166_v55, 2  ;;  %v475_v11 = vrot.slane %v1823_v60, 1 }
  0x1f   : >> { %v514_v56 = vsel %vm247_vm0, %v511_v47, %v513_v54  ;;  %v221_v58 = vsel %vm206_vm1, %v471_v42, %v220_v57  ;;  %v476_v13 = vrot.slane %v1827_v63, 1  ;;  %v515_v16 = vrot.slane %v1823_v60, 2  ;;  %v1909_v57 = vld [vmem:[%s1726_s3 + $0x78] sm:$0xff] }
  0x20   : >> { %v388_v61 = vsel %vm247_vm0, %v511_v47, %v387_v59  ;;  %v262_v12 = vsel %vm247_vm0, %v511_v47, %v261_v62  ;;  %v516_v17 = vrot.slane %v1827_v63, 2  ;;  %v478_v18 = vrot.slane %v1463_v15, 1 }
  0x21   : >> { %554 = vrot.lane.b32.xlu1 %v214_v27, %s1645_s6  ;;  %694 = vrot.lane.b32.xlu0 %v214_v27, %s1646_s7  ;;  %v477_v14 = vsel %vm206_vm1, %v475_v11, %v476_v13  ;;  %v352_v22 = vrot.slane %v1440_v19, 1  ;;  %v518_v24 = vrot.slane %v1463_v15, 2  ;;  %v225_v27 = vrot.slane %v169_v25, 1  ;;  %v1913_v11 = vld [vmem:[%s1726_s3 + $0x80] sm:$0xff] }
  0x22   : >> { %v517_v20 = vsel %vm247_vm0, %v515_v16, %v516_v17  ;;  %v479_v21 = vsel %vm206_vm1, %v476_v13, %v478_v18  ;;  %v392_v29 = vrot.slane %v1440_v19, 2  ;;  %v266_v32 = vrot.slane %v169_v25, 2 }
  0x23   : >> { %v353_v23 = vsel %vm206_vm1, %v476_v13, %v352_v22  ;;  %v519_v26 = vsel %vm247_vm0, %v516_v17, %v518_v24  ;;  %v226_v28 = vsel %vm206_vm1, %v476_v13, %v225_v27  ;;  %v357_v47 = vrot.slane %v1443_v44, 1 }
  0x24   : >> { %v523_v49 = vrot.slane %v1466_v40, 2  ;;  %v397_v54 = vrot.slane %v1443_v44, 2  ;;  %v526_v22 = vrot.slane %v1913_v11, 2  ;;  %vm1070_vm11 = vcmask 293888  }
  0x25   : >> { %742 = vrot.lane.b32.xlu1 %v381_v30, %s1647_s8  ;;  %696 = vrot.lane.b32.xlu0 %v343_v31, %s1646_s7  ;;  %v393_v31 = vsel %vm247_vm0, %v516_v17, %v392_v29  ;;  %vm1344_vm12 = vcmask (%p149_p4), 1040384  }
  0x29   : >> { %602 = vrot.lane.b32.xlu1 %v381_v30, %s1644_s5  ;;  %556 = vrot.lane.b32.xlu0 %v216_v33, %s1645_s6  ;;  %v1864_v30 = vld [vmem:[%s1726_s3 + $0x60] sm:$0xff]  ;;  %v1868_v33 = vld [vmem:[%s1726_s3 + $0x68] sm:$0xff] }
  0x2a   : >> { %v480_v34 = vrot.slane %v1864_v30, 1  ;;  %v481_v37 = vrot.slane %v1868_v33, 1  ;;  %v521_v42 = vrot.slane %v1868_v33, 2 }
  0x2c   : >> { %v482_v39 = vsel %vm206_vm1, %v480_v34, %v481_v37  ;;  %v358_v48 = vsel %vm206_vm1, %v481_v37, %v357_v47 }
  0x2d   : >> { %790 = vrot.lane.b32.xlu1 %v1774_v35, %s1648_s10  ;;  %744 = vrot.lane.b32.xlu0 %v383_v36, %s1647_s8  ;;  %v267_v36 = vsel %vm247_vm0, %v516_v17, %v266_v32 }
  0x31   : >> { %650 = vrot.lane.b32.xlu1 %v1774_v35, %s1643_s4  ;;  %604 = vrot.lane.b32.xlu0 %v257_v41, %s1644_s5  ;;  %v520_v41 = vrot.slane %v1864_v30, 2 }
  0x33   : >> { %v522_v45 = vsel %vm247_vm0, %v520_v41, %v521_v42 }
  0x35   : >> { %838 = vrot.lane.b32.xlu1 %v472_v43, %s1649_s11  ;;  %792 = vrot.lane.b32.xlu0 %v1778_v38, %s1648_s10 }
  0x39   : >> { %698 = vrot.lane.b32.xlu1 %v472_v43, %s1646_s7  ;;  %652 = vrot.lane.b32.xlu0 %v1778_v38, %s1643_s4 }
  0x3d   : >> { %886 = vrot.lane.b32.xlu1 %v512_v50, %s1650_s12  ;;  %840 = vrot.lane.b32.xlu0 %v474_v51, %s1649_s11  ;;  %v524_v51 = vsel %vm247_vm0, %v521_v42, %v523_v49 }
  0x41   : >> { %700 = vrot.lane.b32.xlu1 %v348_v53, %s1646_s7  ;;  %558 = vrot.lane.b32.xlu0 %v472_v43, %s1645_s6  ;;  %v483_v43 = vrot.slane %v1466_v40, 1  ;;  %v175_v40 = vld [vmem:[%s1726_s3 + $0x88] sm:$0x3] }
  0x43   : >> { %v484_v46 = vsel %vm206_vm1, %v481_v37, %v483_v43 }
  0x45   : >> { %888 = vrot.lane.b32.xlu1 %v514_v56, %s1650_s12  ;;  %746 = vrot.lane.b32.xlu0 %v512_v50, %s1647_s8 }
  0x49   : >> { %606 = vrot.lane.b32.xlu1 %v512_v50, %s1644_s5  ;;  %560 = vrot.lane.b32.xlu0 %v221_v58, %s1645_s6  ;;  %v172_v50 = vld [vmem:[%s1726_s3 + $0x70] sm:$0x3]  ;;  %v398_v58 = vsel %vm247_vm0, %v521_v42, %v397_v54 }
  0x4a   : >> { %v230_v52 = vrot.slane %v172_v50, 1  ;;  %v271_v59 = vrot.slane %v172_v50, 2 }
  0x4c   : >> { %v231_v53 = vsel %vm206_vm1, %v481_v37, %v230_v52  ;;  %v272_v13 = vsel %vm247_vm0, %v521_v42, %v271_v59  ;;  %v235_v42 = vrot.slane %v175_v40, 1  ;;  %v276_v52 = vrot.slane %v175_v40, 2  ;;  %v1977_v59 = vld [vmem:[%s1726_s3 + $0x98] sm:$0xff] }
  0x4d   : >> { %794 = vrot.lane.b32.xlu1 %v1823_v60, %s1648_s10  ;;  %748 = vrot.lane.b32.xlu0 %v388_v61, %s1647_s8 }
  0x51   : >> { %654 = vrot.lane.b32.xlu1 %v1823_v60, %s1643_s4  ;;  %608 = vrot.lane.b32.xlu0 %v262_v12, %s1644_s5  ;;  %v485_v12 = vrot.slane %v1909_v57, 1 }
  0x55   : >> { %842 = vrot.lane.b32.xlu1 %v477_v14, %s1649_s11  ;;  %796 = vrot.lane.b32.xlu0 %v1827_v63, %s1648_s10 }
  0x59   : >> { %702 = vrot.lane.b32.xlu1 %v477_v14, %s1646_s7  ;;  %656 = vrot.lane.b32.xlu0 %v1827_v63, %s1643_s4 }
  0x5d   : >> { %890 = vrot.lane.b32.xlu1 %v517_v20, %s1650_s12  ;;  %844 = vrot.lane.b32.xlu0 %v479_v21, %s1649_s11  ;;  %v525_v21 = vrot.slane %v1909_v57, 2 }
  0x5f   : >> { %v527_v27 = vsel %vm247_vm0, %v525_v21, %v526_v22 }
  0x61   : >> { %704 = vrot.lane.b32.xlu1 %v353_v23, %s1646_s7  ;;  %562 = vrot.lane.b32.xlu0 %v477_v14, %s1645_s6  ;;  %v486_v14 = vrot.slane %v1913_v11, 1 }
  0x63   : >> { %v487_v17 = vsel %vm206_vm1, %v485_v12, %v486_v14 }
  0x65   : >> { %892 = vrot.lane.b32.xlu1 %v519_v26, %s1650_s12  ;;  %750 = vrot.lane.b32.xlu0 %v517_v20, %s1647_s8  ;;  %v1446_v26 = vld [vmem:[%s1726_s3 + $0x88] sm:$0x3] }
  0x66   : >> { %v362_v29 = vrot.slane %v1446_v26, 1  ;;  %v402_v47 = vrot.slane %v1446_v26, 2 }
  0x68   : >> { %v363_v34 = vsel %vm206_vm1, %v486_v14, %v362_v29 }
  0x69   : >> { %610 = vrot.lane.b32.xlu1 %v517_v20, %s1644_s5  ;;  %564 = vrot.lane.b32.xlu0 %v226_v28, %s1645_s6  ;;  %v1469_v20 = vld [vmem:[%s1726_s3 + $0x88] sm:$0x3] }
  0x6a   : >> { %v488_v23 = vrot.slane %v1469_v20, 1 }
  0x6c   : >> { %v489_v28 = vsel %vm206_vm1, %v486_v14, %v488_v23 }
  0x6d   : >> { %798 = vrot.lane.b32.xlu1 %v1864_v30, %s1648_s10  ;;  %752 = vrot.lane.b32.xlu0 %v393_v31, %s1647_s8 }
  0x71   : >> { %658 = vrot.lane.b32.xlu1 %v1864_v30, %s1643_s4  ;;  %612 = vrot.lane.b32.xlu0 %v267_v36, %s1644_s5  ;;  %v528_v36 = vrot.slane %v1469_v20, 2 }
  0x73   : >> { %v529_v41 = vsel %vm247_vm0, %v526_v22, %v528_v36 }
  0x75   : >> { %846 = vrot.lane.b32.xlu1 %v482_v39, %s1649_s11  ;;  %800 = vrot.lane.b32.xlu0 %v1868_v33, %s1648_s10 }
  0x79   : >> { %706 = vrot.lane.b32.xlu1 %v482_v39, %s1646_s7  ;;  %660 = vrot.lane.b32.xlu0 %v1868_v33, %s1643_s4 }
  0x7d   : >> { %894 = vrot.lane.b32.xlu1 %v522_v45, %s1650_s12  ;;  %848 = vrot.lane.b32.xlu0 %v484_v46, %s1649_s11  ;;  %v236_v46 = vsel %vm206_vm1, %v486_v14, %v235_v42  ;;  %v277_v14 = vsel %vm247_vm0, %v526_v22, %v276_v52  ;;  %v1449_v42 = vld [vmem:[%s1726_s3 + $0xa0] sm:$0x3] }
  0x81   : >> { %708 = vrot.lane.b32.xlu1 %v358_v48, %s1646_s7  ;;  %566 = vrot.lane.b32.xlu0 %v482_v39, %s1645_s6 }
  0x85   : >> { %896 = vrot.lane.b32.xlu1 %v524_v51, %s1650_s12  ;;  %754 = vrot.lane.b32.xlu0 %v522_v45, %s1647_s8  ;;  %v403_v51 = vsel %vm247_vm0, %v526_v22, %v402_v47 }
  0x87   : >> { %v1902_v55 = vpop.permute.xlu1 %648  ;;  %v1904_v56 = vpop.permute.xlu0 %646 }
  0x89   : >> { %614 = vrot.lane.b32.xlu1 %v522_v45, %s1644_s5  ;;  %568 = vrot.lane.b32.xlu0 %v231_v53, %s1645_s6 }
  0x8b   : >> { %v599_v61 = vpop.permute.xlu1 %598  ;;  %v551_v62 = vpop.permute.xlu0 %550 }
  0x8c   : >> { %v935_v45 = vsel %vm934_vm3, %v1735_v9, %v551_v62  ;;  %v1967_v9 = vld [vmem:[%s1726_s3 + $0x90] sm:$0xff] }
  0x8d   : >> { %802 = vrot.lane.b32.xlu1 %v1909_v57, %s1648_s10  ;;  %756 = vrot.lane.b32.xlu0 %v398_v58, %s1647_s8  ;;  %v952_v50 = vsel %vm951_vm4, %v935_v45, %v599_v61 }
  0x8e   : >> { %v969_v53 = vsel %vm968_vm5, %v952_v50, %v1904_v56 }
  0x8f   : >> { %v1921_v15 = vpop.permute.xlu1 %600  ;;  %v553_v16 = vpop.permute.xlu0 %552 }
  0x90   : >> { %v936_v62 = vsel %vm934_vm3, %v1742_v10, %v553_v16 }
  0x91   : >> { %662 = vrot.lane.b32.xlu1 %v1909_v57, %s1643_s4  ;;  %616 = vrot.lane.b32.xlu0 %v272_v13, %s1644_s5  ;;  %v490_v13 = vrot.slane %v1967_v9, 1  ;;  %v953_v20 = vsel %vm951_vm4, %v936_v62, %v1921_v15  ;;  %v1472_v15 = vld [vmem:[%s1726_s3 + $0xa0] sm:$0x3] }
  0x92   : >> { %v970_v23 = vsel %vm968_vm5, %v953_v20, %v1902_v55  ;;  %v531_v55 = vrot.slane %v1977_v59, 2  ;;  %v493_v36 = vrot.slane %v1472_v15, 1  ;;  %v533_v50 = vrot.slane %v1472_v15, 2 }
  0x93   : >> { %v1927_v18 = vpop.permute.xlu1 %554  ;;  %v695_v19 = vpop.permute.xlu0 %694 }
  0x94   : >> { %v986_v61 = vsel %vm985_vm6, %v969_v53, %v695_v19  ;;  %v178_v53 = vld [vmem:[%s1726_s3 + $0xa0] sm:$0x3] }
  0x95   : >> { %850 = vrot.lane.b32.xlu1 %v487_v17, %s1649_s11  ;;  %804 = vrot.lane.b32.xlu0 %v1913_v11, %s1648_s10  ;;  %v240_v62 = vrot.slane %v178_v53, 1 }
  0x97   : >> { %v743_v24 = vpop.permute.xlu1 %742  ;;  %v1935_v25 = vpop.permute.xlu0 %696 }
  0x98   : >> { %v1003_v12 = vsel %vm1002_vm7, %v986_v61, %v743_v24  ;;  %v534_v61 = vsel %vm247_vm0, %v531_v55, %v533_v50 }
  0x99   : >> { %710 = vrot.lane.b32.xlu1 %v487_v17, %s1646_s7  ;;  %664 = vrot.lane.b32.xlu0 %v1913_v11, %s1643_s4 }
  0x9b   : >> { %v1943_v31 = vpop.permute.xlu1 %602  ;;  %v1945_v32 = vpop.permute.xlu0 %556 }
  0x9d   : >> { %898 = vrot.lane.b32.xlu1 %v527_v27, %s1650_s12  ;;  %852 = vrot.lane.b32.xlu0 %v489_v28, %s1649_s11 }
  0x9f   : >> { %v791_v37 = vpop.permute.xlu1 %790  ;;  %v745_v39 = vpop.permute.xlu0 %744 }
  0xa0   : >> { %v1020_v56 = vsel %vm1019_vm8, %v1003_v12, %v791_v37 }
  0xa1   : >> { %712 = vrot.lane.b32.xlu1 %v363_v34, %s1646_s7  ;;  %570 = vrot.lane.b32.xlu0 %v487_v17, %s1645_s6  ;;  %v491_v17 = vrot.slane %v1977_v59, 1  ;;  %v530_v34 = vrot.slane %v1967_v9, 2 }
  0xa3   : >> { %v1954_v43 = vpop.permute.xlu1 %650  ;;  %v1956_v44 = vpop.permute.xlu0 %604  ;;  %v492_v22 = vsel %vm206_vm1, %v490_v13, %v491_v17  ;;  %v494_v45 = vsel %vm206_vm1, %v491_v17, %v493_v36  ;;  %v241_v13 = vsel %vm206_vm1, %v491_v17, %v240_v62  ;;  %v1452_v62 = vld [vmem:[%s1726_s3 + $0xb8] sm:$0x3] }
  0xa5   : >> { %900 = vrot.lane.b32.xlu1 %v529_v41, %s1650_s12  ;;  %758 = vrot.lane.b32.xlu0 %v527_v27, %s1647_s8 }
  0xa7   : >> { %v839_v48 = vpop.permute.xlu1 %838  ;;  %v793_v49 = vpop.permute.xlu0 %792 }
  0xa8   : >> { %v1037_v19 = vsel %vm1036_vm9, %v1020_v56, %v839_v48 }
  0xa9   : >> { %618 = vrot.lane.b32.xlu1 %v527_v27, %s1644_s5  ;;  %572 = vrot.lane.b32.xlu0 %v236_v46, %s1645_s6  ;;  %v987_v27 = vsel %vm985_vm6, %v970_v23, %v1935_v25  ;;  %v367_v46 = vrot.slane %v1449_v42, 1  ;;  %v281_v23 = vrot.slane %v178_v53, 2 }
  0xaa   : >> { %v1004_v28 = vsel %vm1002_vm7, %v987_v27, %v745_v39  ;;  %v532_v39 = vsel %vm247_vm0, %v530_v34, %v531_v55 }
  0xab   : >> { %v1972_v54 = vpop.permute.xlu1 %698  ;;  %v1974_v58 = vpop.permute.xlu0 %652  ;;  %v1021_v29 = vsel %vm1019_vm8, %v1004_v28, %v793_v49  ;;  %v368_v49 = vsel %vm206_vm1, %v491_v17, %v367_v46 }
  0xad   : >> { %806 = vrot.lane.b32.xlu1 %v1967_v9, %s1648_s10  ;;  %760 = vrot.lane.b32.xlu0 %v403_v51, %s1647_s8 }
  0xaf   : >> { %v887_v10 = vpop.permute.xlu1 %886  ;;  %v841_v16 = vpop.permute.xlu0 %840 }
  0xb0   : >> { %v1054_v21 = vsel %vm1053_vm10, %v1037_v19, %v887_v10  ;;  %v1038_v37 = vsel %vm1036_vm9, %v1021_v29, %v841_v16  ;;  %v937_v16 = vsel %vm934_vm3, %v1732_v8, %v1927_v18  ;;  %v2060_v8 = vld [vmem:[%s1726_s3 + $0xb0] sm:$0xff]  ;;  %v282_v29 = vsel %vm247_vm0, %v531_v55, %v281_v23 }
  0xb1   : >> { %666 = vrot.lane.b32.xlu1 %v1967_v9, %s1643_s4  ;;  %620 = vrot.lane.b32.xlu0 %v277_v14, %s1644_s5  ;;  %v407_v14 = vrot.slane %v1449_v42, 2  ;;  %v954_v20 = vsel %vm951_vm4, %v937_v16, %v1943_v31  ;;  %v496_v34 = vrot.slane %v2060_v8, 1 }
  0xb2   : >> { %1532 = vmatprep.mubr.msk.f32.mxu0 %vm1070_vm11, %v1054_v21  ;;  %v2050_v21 = vld [vmem:[%s1726_s3 + $0xa8] sm:$0xff]  ;;  %v971_v17 = vsel %vm968_vm5, %v954_v20, %v1954_v43 }
  0xb3   : >> { %v2001_v24 = vpop.permute.xlu1 %700  ;;  %v2003_v26 = vpop.permute.xlu0 %558  ;;  %v988_v18 = vsel %vm985_vm6, %v971_v17, %v1972_v54  ;;  %v495_v43 = vrot.slane %v2050_v21, 1  ;;  %v181_v17 = vld [vmem:[%s1726_s3 + $0xb8] sm:$0x3] }
  0xb5   : >> { %854 = vrot.lane.b32.xlu1 %v492_v22, %s1649_s11  ;;  %808 = vrot.lane.b32.xlu0 %v1977_v59, %s1648_s10  ;;  %v497_v42 = vsel %vm206_vm1, %v495_v43, %v496_v34 }
  0xb7   : >> { %v889_v40 = vpop.permute.xlu1 %888  ;;  %v747_v41 = vpop.permute.xlu0 %746 }
  0xb8   : >> { %v1055_v25 = vsel %vm1053_vm10, %v1038_v37, %v889_v40  ;;  %v1005_v28 = vsel %vm1002_vm7, %v988_v18, %v747_v41  ;;  %v938_v41 = vsel %vm934_vm3, %v1729_v7, %v1945_v32  ;;  %v1475_v7 = vld [vmem:[%s1726_s3 + $0xb8] sm:$0x3] }
  0xb9   : >> { %714 = vrot.lane.b32.xlu1 %v492_v22, %s1646_s7  ;;  %668 = vrot.lane.b32.xlu0 %v1977_v59, %s1643_s4  ;;  %v498_v50 = vrot.slane %v1475_v7, 1  ;;  %v538_v20 = vrot.slane %v1475_v7, 2 }
  0xba   : >> { %1533 = vmatmul.mubr.msk.f32.vlgmr.msra.gmra.mrb[0].mxu0 %vm1070_vm11, %v1055_v25 }
  0xbb   : >> { %v2024_v47 = vpop.permute.xlu1 %606  ;;  %v2026_v48 = vpop.permute.xlu0 %560 }
  0xbd   : >> { %902 = vrot.lane.b32.xlu1 %v532_v39, %s1650_s12  ;;  %856 = vrot.lane.b32.xlu0 %v494_v45, %s1649_s11 }
  0xbf   : >> { %v795_v51 = vpop.permute.xlu1 %794  ;;  %v749_v52 = vpop.permute.xlu0 %748 }
  0xc0   : >> { %v1022_v31 = vsel %vm1019_vm8, %v1005_v28, %v795_v51  ;;  %v245_v28 = vrot.slane %v181_v17, 1 }
  0xc1   : >> { %716 = vrot.lane.b32.xlu1 %v368_v49, %s1646_s7  ;;  %574 = vrot.lane.b32.xlu0 %v492_v22, %s1645_s6  ;;  %v408_v22 = vsel %vm247_vm0, %v531_v55, %v407_v14  ;;  %v955_v55 = vsel %vm951_vm4, %v938_v41, %v1956_v44  ;;  %v535_v49 = vrot.slane %v2050_v21, 2  ;;  %v372_v14 = vrot.slane %v1452_v62, 1 }
  0xc2   : >> { %v972_v25 = vsel %vm968_vm5, %v955_v55, %v1974_v58  ;;  %v536_v58 = vrot.slane %v2060_v8, 2  ;;  %v1476_v55 = vld [vmem:[%s1726_s3 + $0xc0] sm:$0xff] }
  0xc3   : >> { %v2035_v12 = vpop.permute.xlu1 %654  ;;  %v2037_v56 = vpop.permute.xlu0 %608  ;;  %v989_v32 = vsel %vm985_vm6, %v972_v25, %v2001_v24  ;;  %v373_v16 = vsel %vm206_vm1, %v496_v34, %v372_v14  ;;  %v286_v25 = vrot.slane %v181_v17, 2 }
  0xc4   : >> { %v1006_v46 = vsel %vm1002_vm7, %v989_v32, %v749_v52  ;;  %v537_v52 = vsel %vm247_vm0, %v535_v49, %v536_v58  ;;  %v539_v18 = vsel %vm247_vm0, %v536_v58, %v538_v20 }
  0xc5   : >> { %904 = vrot.lane.b32.xlu1 %v534_v61, %s1650_s12  ;;  %762 = vrot.lane.b32.xlu0 %v532_v39, %s1647_s8 }
  0xc7   : >> { %v843_v19 = vpop.permute.xlu1 %842  ;;  %v797_v10 = vpop.permute.xlu0 %796 }
  0xc8   : >> { %v1039_v36 = vsel %vm1036_vm9, %v1022_v31, %v843_v19  ;;  %v1023_v44 = vsel %vm1019_vm8, %v1006_v46, %v797_v10  ;;  %v1477_v46 = vld [vmem:[%s1726_s3 + $0xc8] sm:$0xff] }
  0xc9   : >> { %622 = vrot.lane.b32.xlu1 %v532_v39, %s1644_s5  ;;  %576 = vrot.lane.b32.xlu0 %v241_v13, %s1645_s6  ;;  %v499_v13 = vsel %vm206_vm1, %v496_v34, %v498_v50  ;;  %v501_v49 = vrot.slane %v1477_v46, 1  ;;  %v541_v20 = vrot.slane %v1477_v46, 2 }
  0xcb   : >> { %v2055_v15 = vpop.permute.xlu1 %702  ;;  %v2057_v27 = vpop.permute.xlu0 %656 }
  0xcd   : >> { %810 = vrot.lane.b32.xlu1 %v2050_v21, %s1648_s10  ;;  %764 = vrot.lane.b32.xlu0 %v408_v22, %s1647_s8 }
  0xcf   : >> { %v891_v37 = vpop.permute.xlu1 %890  ;;  %v845_v54 = vpop.permute.xlu0 %844 }
  0xd0   : >> { %v1056_v40 = vsel %vm1053_vm10, %v1039_v36, %v891_v37  ;;  %v1040_v51 = vsel %vm1036_vm9, %v1023_v44, %v845_v54  ;;  %v412_v36 = vrot.slane %v1452_v62, 2  ;;  %v500_v44 = vrot.slane %v1476_v55, 1 }
  0xd1   : >> { %670 = vrot.lane.b32.xlu1 %v2050_v21, %s1643_s4  ;;  %624 = vrot.lane.b32.xlu0 %v282_v29, %s1644_s5  ;;  %v246_v29 = vsel %vm206_vm1, %v496_v34, %v245_v28  ;;  %v1455_v28 = vld [vmem:[%s1726_s3 + $0xd0] sm:$0x3] }
  0xd2   : >> { %1535 = vmatprep.mubr.msk.f32.mxu0 %vm1070_vm11, %v1056_v40  ;;  %v939_v40 = vsel %vm934_vm3, %v1774_v35, %v2003_v26 }
  0xd3   : >> { %v2086_v39 = vpop.permute.xlu1 %704  ;;  %v2088_v45 = vpop.permute.xlu0 %562  ;;  %v956_v41 = vsel %vm951_vm4, %v939_v40, %v2024_v47 }
  0xd4   : >> { %v973_v34 = vsel %vm968_vm5, %v956_v41, %v2035_v12  ;;  %v287_v12 = vsel %vm247_vm0, %v536_v58, %v286_v25  ;;  %v417_v41 = vrot.slane %v1455_v28, 2 }
  0xd5   : >> { %858 = vrot.lane.b32.xlu1 %v497_v42, %s1649_s11  ;;  %812 = vrot.lane.b32.xlu0 %v2060_v8, %s1648_s10  ;;  %v990_v35 = vsel %vm985_vm6, %v973_v34, %v2055_v15  ;;  %v940_v15 = vsel %vm934_vm3, %v1778_v38, %v2026_v48  ;;  %v1478_v38 = vld [vmem:[%s1726_s3 + $0xd0] sm:$0x3] }
  0xd6   : >> { %v418_v34 = vsel %vm247_vm0, %v541_v20, %v417_v41 }
  0xd7   : >> { %v893_v53 = vpop.permute.xlu1 %892  ;;  %v751_v61 = vpop.permute.xlu0 %750 }
  0xd8   : >> { %v1057_v24 = vsel %vm1053_vm10, %v1040_v51, %v893_v53  ;;  %v1007_v26 = vsel %vm1002_vm7, %v990_v35, %v751_v61  ;;  %v957_v61 = vsel %vm951_vm4, %v940_v15, %v2037_v56  ;;  %v941_v15 = vsel %vm934_vm3, %v1823_v60, %v2088_v45 }
  0xd9   : >> { %718 = vrot.lane.b32.xlu1 %v497_v42, %s1646_s7  ;;  %672 = vrot.lane.b32.xlu0 %v2060_v8, %s1643_s4 }
  0xda   : >> { %1536 = vmatmul.mubr.msk.f32.gmra.mrb[2].mxu0 %vm1070_vm11, %v1057_v24  ;;  %v974_v24 = vsel %vm968_vm5, %v957_v61, %v2057_v27 }
  0xdb   : >> { %v2109_v19 = vpop.permute.xlu1 %610  ;;  %v2111_v10 = vpop.permute.xlu0 %564  ;;  %v991_v48 = vsel %vm985_vm6, %v974_v24, %v2086_v39 }
  0xdc   : >> { %v958_v24 = vsel %vm951_vm4, %v941_v15, %v2109_v19 }
  0xdd   : >> { %906 = vrot.lane.b32.xlu1 %v537_v52, %s1650_s12  ;;  %860 = vrot.lane.b32.xlu0 %v499_v13, %s1649_s11 }
  0xdf   : >> { %v799_v22 = vpop.permute.xlu1 %798  ;;  %v753_v23 = vpop.permute.xlu0 %752 }
  0xe0   : >> { %v1024_v47 = vsel %vm1019_vm8, %v1007_v26, %v799_v22  ;;  %v1008_v14 = vsel %vm1002_vm7, %v991_v48, %v753_v23  ;;  %v503_v22 = vrot.slane %v1478_v38, 1 }
  0xe1   : >> { %720 = vrot.lane.b32.xlu1 %v373_v16, %s1646_s7  ;;  %578 = vrot.lane.b32.xlu0 %v497_v42, %s1645_s6  ;;  %v413_v42 = vsel %vm247_vm0, %v536_v58, %v412_v36  ;;  %v502_v58 = vsel %vm206_vm1, %v500_v44, %v501_v49  ;;  %v540_v16 = vrot.slane %v1476_v55, 2  ;;  %v377_v36 = vrot.slane %v1455_v28, 1  ;;  %v1479_v44 = vld [vmem:[%s1726_s3 + $0xd8] sm:$0xff] }
  0xe2   : >> { %v504_v23 = vsel %vm206_vm1, %v501_v49, %v503_v22 }
  0xe3   : >> { %v2120_v31 = vpop.permute.xlu1 %658  ;;  %v2122_v43 = vpop.permute.xlu0 %612  ;;  %v542_v39 = vsel %vm247_vm0, %v540_v16, %v541_v20  ;;  %v378_v40 = vsel %vm206_vm1, %v501_v49, %v377_v36 }
  0xe5   : >> { %908 = vrot.lane.b32.xlu1 %v539_v18, %s1650_s12  ;;  %766 = vrot.lane.b32.xlu0 %v537_v52, %s1647_s8 }
  0xe7   : >> { %v847_v37 = vpop.permute.xlu1 %846  ;;  %v801_v54 = vpop.permute.xlu0 %800 }
  0xe8   : >> { %v1041_v50 = vsel %vm1036_vm9, %v1024_v47, %v847_v37  ;;  %v1025_v56 = vsel %vm1019_vm8, %v1008_v14, %v801_v54  ;;  %v1480_v47 = vld [vmem:[%s1726_s3 + $0xe0] sm:$0xff] }
  0xe9   : >> { %626 = vrot.lane.b32.xlu1 %v537_v52, %s1644_s5  ;;  %580 = vrot.lane.b32.xlu0 %v246_v29, %s1645_s6  ;;  %v506_v49 = vrot.slane %v1480_v47, 1  ;;  %v546_v61 = vrot.slane %v1480_v47, 2 }
  0xeb   : >> { %v2138_v7 = vpop.permute.xlu1 %706  ;;  %v2140_v32 = vpop.permute.xlu0 %660 }
  0xed   : >> { %814 = vrot.lane.b32.xlu1 %v1476_v55, %s1648_s10  ;;  %768 = vrot.lane.b32.xlu0 %v413_v42, %s1647_s8 }
  0xef   : >> { %v895_v51 = vpop.permute.xlu1 %894  ;;  %v849_v53 = vpop.permute.xlu0 %848 }
  0xf0   : >> { %v1058_v62 = vsel %vm1053_vm10, %v1041_v50, %v895_v51  ;;  %v1042_v27 = vsel %vm1036_vm9, %v1025_v56, %v849_v53  ;;  %v505_v50 = vrot.slane %v1479_v44, 1  ;;  %v975_v56 = vsel %vm968_vm5, %v958_v24, %v2120_v31 }
  0xf1   : >> { %674 = vrot.lane.b32.xlu1 %v1476_v55, %s1643_s4  ;;  %628 = vrot.lane.b32.xlu0 %v287_v12, %s1644_s5  ;;  %v543_v55 = vrot.slane %v1478_v38, 2  ;;  %v1481_v12 = vld [vmem:[%s1726_s3 + $0xe8] sm:$0x3]  ;;  %v992_v60 = vsel %vm985_vm6, %v975_v56, %v2138_v7  ;;  %v942_v7 = vsel %vm934_vm3, %v1827_v63, %v2111_v10 }
  0xf2   : >> { %1538 = vmatprep.mubr.msk.f32.mxu0 %vm1070_vm11, %v1058_v62  ;;  %v508_v51 = vrot.slane %v1481_v12, 1  ;;  %v507_v48 = vsel %vm206_vm1, %v505_v50, %v506_v49  ;;  %v548_v14 = vrot.slane %v1481_v12, 2 }
  0xf3   : >> { %v2163_v52 = vpop.permute.xlu1 %708  ;;  %v2165_v13 = vpop.permute.xlu0 %566 }
  0xf4   : >> { %v509_v38 = vsel %vm206_vm1, %v506_v49, %v508_v51  ;;  %v549_v22 = vsel %vm247_vm0, %v546_v61, %v548_v14 }
  0xf5   : >> { %862 = vrot.lane.b32.xlu1 %v502_v58, %s1649_s11  ;;  %816 = vrot.lane.b32.xlu0 %v1477_v46, %s1648_s10 }
  0xf7   : >> { %v897_v17 = vpop.permute.xlu1 %896  ;;  %v755_v18 = vpop.permute.xlu0 %754 }
  0xf8   : >> { %v1059_v29 = vsel %vm1053_vm10, %v1042_v27, %v897_v17  ;;  %v1009_v45 = vsel %vm1002_vm7, %v992_v60, %v755_v18  ;;  %v959_v18 = vsel %vm951_vm4, %v942_v7, %v2122_v43 }
  0xf9   : >> { %722 = vrot.lane.b32.xlu1 %v502_v58, %s1646_s7  ;;  %676 = vrot.lane.b32.xlu0 %v1477_v46, %s1643_s4  ;;  %v544_v46 = vsel %vm247_vm0, %v541_v20, %v543_v55  ;;  %v545_v58 = vrot.slane %v1479_v44, 2 }
  0xfa   : >> { %1539 = vmatmul.mubr.msk.f32.gmra.mrb[4].mxu0 %vm1070_vm11, %v1059_v29 }
  0xfb   : >> { %v2182_v37 = vpop.permute.xlu1 %614  ;;  %v2184_v54 = vpop.permute.xlu0 %568  ;;  %v547_v27 = vsel %vm247_vm0, %v545_v58, %v546_v61 }
  0xfd   : >> { %910 = vrot.lane.b32.xlu1 %v542_v39, %s1650_s12  ;;  %864 = vrot.lane.b32.xlu0 %v504_v23, %s1649_s11 }
  0xff   : >> { %v803_v42 = vpop.permute.xlu1 %802  ;;  %v757_v25 = vpop.permute.xlu0 %756 }
 0x100   : >> { %v1026_v19 = vsel %vm1019_vm8, %v1009_v45, %v803_v42 }
 0x101   : >> { %770 = vrot.lane.b32.xlu1 %v542_v39, %s1647_s8  ;;  %724 = vrot.lane.b32.xlu0 %v378_v40, %s1646_s7  ;;  %v976_v39 = vsel %vm968_vm5, %v959_v18, %v2140_v32 }
 0x102   : >> { %v993_v40 = vsel %vm985_vm6, %v976_v39, %v2163_v52 }
 0x103   : >> { %v663_v35 = vpop.permute.xlu1 %662  ;;  %v2193_v26 = vpop.permute.xlu0 %616  ;;  %v1010_v41 = vsel %vm1002_vm7, %v993_v40, %v757_v25  ;;  %v943_v25 = vsel %vm934_vm3, %v1864_v30, %v2165_v13  ;;  %v944_v30 = vsel %vm934_vm3, %v1868_v33, %v2184_v54 }
 0x104   : >> { %v960_v50 = vsel %vm951_vm4, %v943_v25, %v2182_v37  ;;  %v961_v13 = vsel %vm951_vm4, %v944_v30, %v2193_v26 }
 0x105   : >> { %772 = vrot.lane.b32.xlu1 %v418_v34, %s1647_s8  ;;  %912 = vrot.lane.b32.xlu0 %v544_v46, %s1650_s12  ;;  %v977_v51 = vsel %vm968_vm5, %v960_v50, %v663_v35 }
 0x107   : >> { %v851_v53 = vpop.permute.xlu1 %850  ;;  %v805_v62 = vpop.permute.xlu0 %804 }
 0x108   : >> { %v1043_v17 = vsel %vm1036_vm9, %v1026_v19, %v851_v53  ;;  %v1027_v63 = vsel %vm1019_vm8, %v1010_v41, %v805_v62 }
 0x109   : >> { %820 = vrot.lane.b32.xlu1 %v1480_v47, %s1648_s10  ;;  %818 = vrot.lane.b32.xlu0 %v1479_v44, %s1648_s10 }
 0x10b   : >> { %v711_v16 = vpop.permute.xlu1 %710  ;;  %v665_v20 = vpop.permute.xlu0 %664 }
 0x10c   : >> { %v994_v15 = vsel %vm985_vm6, %v977_v51, %v711_v16  ;;  %v978_v37 = vsel %vm968_vm5, %v961_v13, %v665_v20 }
 0x10d   : >> { %868 = vrot.lane.b32.xlu1 %v509_v38, %s1649_s11  ;;  %866 = vrot.lane.b32.xlu0 %v507_v48, %s1649_s11 }
 0x10f   : >> { %v899_v31 = vpop.permute.xlu1 %898  ;;  %v853_v28 = vpop.permute.xlu0 %852 }
 0x110   : >> { %v1060_v29 = vsel %vm1053_vm10, %v1043_v17, %v899_v31  ;;  %v1044_v10 = vsel %vm1036_vm9, %v1027_v63, %v853_v28 }
 0x111   : >> { %916 = vrot.lane.b32.xlu1 %v549_v22, %s1650_s12  ;;  %914 = vrot.lane.b32.xlu0 %v547_v27, %s1650_s12 }
 0x112   : >> { %1541 = vmatprep.mubr.msk.f32.mxu0 %vm1070_vm11, %v1060_v29 }
 0x113   : >> { %v713_v23 = vpop.permute.xlu1 %712  ;;  %v571_v36 = vpop.permute.xlu0 %570 }
 0x114   : >> { %v995_v16 = vsel %vm985_vm6, %v978_v37, %v713_v23  ;;  %v945_v18 = vsel %vm934_vm3, %v1909_v57, %v571_v36 }
 0x117   : >> { %v901_v55 = vpop.permute.xlu1 %900  ;;  %v759_v42 = vpop.permute.xlu0 %758 }
 0x118   : >> { %v1061_v43 = vsel %vm1053_vm10, %v1044_v10, %v901_v55  ;;  %v1011_v61 = vsel %vm1002_vm7, %v994_v15, %v759_v42 }
 0x119   : >> { %1542 = vmatmul.mubr.msk.f32.gmra.mrb[6].mxu0 %vm1070_vm11, %v1061_v43 }
 0x11b   : >> { %v619_v34 = vpop.permute.xlu1 %618  ;;  %v573_v46 = vpop.permute.xlu0 %572 }
 0x11c   : >> { %v962_v39 = vsel %vm951_vm4, %v945_v18, %v619_v34  ;;  %v946_v57 = vsel %vm934_vm3, %v1913_v11, %v573_v46 }
 0x11f   : >> { %v807_v32 = vpop.permute.xlu1 %806  ;;  %v761_v47 = vpop.permute.xlu0 %760 }
 0x120   : >> { %v1028_v58 = vsel %vm1019_vm8, %v1011_v61, %v807_v32  ;;  %v1012_v60 = vsel %vm1002_vm7, %v995_v16, %v761_v47 }
 0x123   : >> { %v667_v44 = vpop.permute.xlu1 %666  ;;  %v621_v12 = vpop.permute.xlu0 %620 }
 0x124   : >> { %v979_v23 = vsel %vm968_vm5, %v962_v39, %v667_v44  ;;  %v963_v36 = vsel %vm951_vm4, %v946_v57, %v621_v12 }
 0x127   : >> { %v855_v49 = vpop.permute.xlu1 %854  ;;  %v809_v52 = vpop.permute.xlu0 %808 }
 0x128   : >> { %v1045_v24 = vsel %vm1036_vm9, %v1028_v58, %v855_v49  ;;  %v1029_v45 = vsel %vm1019_vm8, %v1012_v60, %v809_v52 }
 0x12b   : >> { %v715_v53 = vpop.permute.xlu1 %714  ;;  %v669_v62 = vpop.permute.xlu0 %668 }
 0x12c   : >> { %v996_v63 = vsel %vm985_vm6, %v979_v23, %v715_v53  ;;  %v980_v34 = vsel %vm968_vm5, %v963_v36, %v669_v62 }
 0x12f   : >> { %v903_v38 = vpop.permute.xlu1 %902  ;;  %v857_v48 = vpop.permute.xlu0 %856 }
 0x130   : >> { %v1062_v14 = vsel %vm1053_vm10, %v1045_v24, %v903_v38  ;;  %v1046_v19 = vsel %vm1036_vm9, %v1029_v45, %v857_v48 }
 0x131   : >> { %1544 = vmatprep.mubr.msk.f32.mxu1 %vm1070_vm11, %v1062_v14 }
 0x133   : >> { %v717_v35 = vpop.permute.xlu1 %716  ;;  %v575_v56 = vpop.permute.xlu0 %574 }
 0x134   : >> { %v997_v52 = vsel %vm985_vm6, %v980_v34, %v717_v35  ;;  %v947_v14 = vsel %vm934_vm3, %v1967_v9, %v575_v56 }
 0x137   : >> { %v905_v22 = vpop.permute.xlu1 %904  ;;  %v763_v27 = vpop.permute.xlu0 %762 }
 0x138   : >> { %v1063_v33 = vsel %vm1053_vm10, %v1046_v19, %v905_v22  ;;  %v1013_v10 = vsel %vm1002_vm7, %v996_v63, %v763_v27 }
 0x139   : >> { %1545 = vmatmul.mubr.msk.f32.vlgmr.msra.gmra.mrb[0].mxu1 %vm1070_vm11, %v1063_v33 }
 0x13b   : >> { %v623_v54 = vpop.permute.xlu1 %622  ;;  %v577_v26 = vpop.permute.xlu0 %576 }
 0x13c   : >> { %v964_v30 = vsel %vm951_vm4, %v947_v14, %v623_v54  ;;  %v948_v9 = vsel %vm934_vm3, %v1977_v59, %v577_v26 }
 0x13f   : >> { %v811_v17 = vpop.permute.xlu1 %810  ;;  %v765_v20 = vpop.permute.xlu0 %764 }
 0x140   : >> { %v1030_v55 = vsel %vm1019_vm8, %v1013_v10, %v811_v17  ;;  %v1014_v25 = vsel %vm1002_vm7, %v997_v52, %v765_v20 }
 0x143   : >> { %v671_v31 = vpop.permute.xlu1 %670  ;;  %v625_v28 = vpop.permute.xlu0 %624 }
 0x144   : >> { %v981_v13 = vsel %vm968_vm5, %v964_v30, %v671_v31  ;;  %v965_v56 = vsel %vm951_vm4, %v948_v9, %v625_v28 }
 0x147   : >> { %v859_v29 = vpop.permute.xlu1 %858  ;;  %v813_v7 = vpop.permute.xlu0 %812 }
 0x148   : >> { %v1047_v42 = vsel %vm1036_vm9, %v1030_v55, %v859_v29  ;;  %v1031_v50 = vsel %vm1019_vm8, %v1014_v25, %v813_v7 }
 0x14b   : >> { %v719_v40 = vpop.permute.xlu1 %718  ;;  %v673_v41 = vpop.permute.xlu0 %672 }
 0x14c   : >> { %v998_v16 = vsel %vm985_vm6, %v981_v13, %v719_v40  ;;  %v982_v54 = vsel %vm968_vm5, %v965_v56, %v673_v41 }
 0x14f   : >> { %v907_v43 = vpop.permute.xlu1 %906  ;;  %v861_v32 = vpop.permute.xlu0 %860 }
 0x150   : >> { %v1064_v47 = vsel %vm1053_vm10, %v1047_v42, %v907_v43  ;;  %v1048_v51 = vsel %vm1036_vm9, %v1031_v50, %v861_v32 }
 0x151   : >> { %1547 = vmatprep.mubr.msk.f32.mxu1 %vm1070_vm11, %v1064_v47 }
 0x153   : >> { %v721_v44 = vpop.permute.xlu1 %720  ;;  %v579_v49 = vpop.permute.xlu0 %578 }
 0x154   : >> { %v999_v31 = vsel %vm985_vm6, %v982_v54, %v721_v44  ;;  %v949_v40 = vsel %vm934_vm3, %v2050_v21, %v579_v49 }
 0x157   : >> { %v909_v53 = vpop.permute.xlu1 %908  ;;  %v767_v15 = vpop.permute.xlu0 %766 }
 0x158   : >> { %v1065_v11 = vsel %vm1053_vm10, %v1048_v51, %v909_v53  ;;  %v1015_v60 = vsel %vm1002_vm7, %v998_v16, %v767_v15 }
 0x159   : >> { %1548 = vmatmul.mubr.msk.f32.gmra.mrb[2].mxu1 %vm1070_vm11, %v1065_v11 }
 0x15b   : >> { %v627_v46 = vpop.permute.xlu1 %626  ;;  %v581_v12 = vpop.permute.xlu0 %580 }
 0x15c   : >> { %v950_v41 = vsel %vm934_vm3, %v2060_v8, %v581_v12  ;;  %v966_v63 = vsel %vm951_vm4, %v949_v40, %v627_v46 }
 0x15f   : >> { %v815_v61 = vpop.permute.xlu1 %814  ;;  %v769_v62 = vpop.permute.xlu0 %768 }
 0x160   : >> { %v1032_v45 = vsel %vm1019_vm8, %v1015_v60, %v815_v61  ;;  %v1016_v29 = vsel %vm1002_vm7, %v999_v31, %v769_v62 }
 0x163   : >> { %v675_v58 = vpop.permute.xlu1 %674  ;;  %v629_v24 = vpop.permute.xlu0 %628 }
 0x164   : >> { %v967_v10 = vsel %vm951_vm4, %v950_v41, %v629_v24  ;;  %v983_v55 = vsel %vm968_vm5, %v966_v63, %v675_v58 }
 0x167   : >> { %v863_v38 = vpop.permute.xlu1 %862  ;;  %v817_v48 = vpop.permute.xlu0 %816 }
 0x168   : >> { %v1049_v19 = vsel %vm1036_vm9, %v1032_v45, %v863_v38  ;;  %v1033_v7 = vsel %vm1019_vm8, %v1016_v29, %v817_v48 }
 0x16b   : >> { %v723_v37 = vpop.permute.xlu1 %722  ;;  %v677_v35 = vpop.permute.xlu0 %676 }
 0x16c   : >> { %v984_v42 = vsel %vm968_vm5, %v967_v10, %v677_v35  ;;  %v1000_v47 = vsel %vm985_vm6, %v983_v55, %v723_v37 }
 0x16f   : >> { %v911_v22 = vpop.permute.xlu1 %910  ;;  %v865_v27 = vpop.permute.xlu0 %864 }
 0x170   : >> { %v1066_v33 = vsel %vm1053_vm10, %v1049_v19, %v911_v22  ;;  %v1050_v18 = vsel %vm1036_vm9, %v1033_v7, %v865_v27 }
 0x171   : >> { %1550 = vmatprep.mubr.msk.f32.mxu1 %vm1070_vm11, %v1066_v33 }
 0x173   : >> { %v771_v17 = vpop.permute.xlu1 %770  ;;  %v725_v20 = vpop.permute.xlu0 %724 }
 0x174   : >> { %v1001_v57 = vsel %vm985_vm6, %v984_v42, %v725_v20  ;;  %v1017_v36 = vsel %vm1002_vm7, %v1000_v47, %v771_v17 }
 0x177   : >> { %v773_v39 = vpop.permute.xlu1 %772  ;;  %v913_v23 = vpop.permute.xlu0 %912 }
 0x178   : >> { %v1067_v59 = vsel %vm1053_vm10, %v1050_v18, %v913_v23  ;;  %v1018_v21 = vsel %vm1002_vm7, %v1001_v57, %v773_v39 }
 0x179   : >> { %1551 = vmatmul.mubr.msk.f32.gmra.mrb[4].mxu1 %vm1070_vm11, %v1067_v59 }
 0x17b   : >> { %v821_v26 = vpop.permute.xlu1 %820  ;;  %v819_v28 = vpop.permute.xlu0 %818 }
 0x17c   : >> { %v1035_v8 = vsel %vm1019_vm8, %v1018_v21, %v821_v26  ;;  %v1034_v34 = vsel %vm1019_vm8, %v1017_v36, %v819_v28 }
 0x17f   : >> { %v869_v43 = vpop.permute.xlu1 %868  ;;  %v867_v32 = vpop.permute.xlu0 %866 }
 0x180   : >> { %v1052_v44 = vsel %vm1036_vm9, %v1035_v8, %v869_v43  ;;  %v1051_v49 = vsel %vm1036_vm9, %v1034_v34, %v867_v32 }
 0x183   : >> { %v917_v52 = vpop.permute.xlu1 %916  ;;  %v915_v25 = vpop.permute.xlu0 %914 }
 0x184   : >> { %v1069_v50 = vsel %vm1053_vm10, %v1052_v44, %v917_v52  ;;  %v1068_v51 = vsel %vm1053_vm10, %v1051_v49, %v915_v25 }
 0x185   : >> { %1553 = vmatprep.mubr.msk.f32.mxu1 %vm1070_vm11, %v1068_v51 }
 0x186   : >> { %1554 = vmatmul.mubr.msk.f32.gmra.mrb[6].mxu1 %vm1070_vm11, %v1069_v50 }
 0x18d   : >> { %v1534_v53 = vpop.f32.mrb[0].mxu0 }
 0x18e   : >> { %v1269_v15 = vmax.f32 %v1534_v53, 0.0  ;;  %v1189_v11 = vpop.f32.mrb[1].mxu0 }
 0x18f   : >> { %v1268_v46 = vmax.f32 %v1189_v11, 0.0 }
 0x190   : >> { %v1307_v12 = vmul.f32 %v1269_v15, %v1269_v15 }
 0x191   : >> { %v1284_v61 = vadd.f32 %v1269_v15, %v1268_v46  ;;  %v1306_v62 = vmul.f32 %v1268_v46, %v1268_v46 }
 0x193   : >> { %v1322_v58 = vadd.f32 %v1307_v12, %v1306_v62 }
 0x1ad   : >> { %v1537_v24 = vpop.f32.mrb[2].mxu0 }
 0x1ae   : >> { %v1199_v38 = vpop.f32.mrb[3].mxu0  ;;  %v1271_v48 = vmax.f32 %v1537_v24, 0.0 }
 0x1af   : >> { %v1270_v14 = vmax.f32 %v1199_v38, 0.0 }
 0x1b0   : >> { %v1309_v37 = vmul.f32 %v1271_v48, %v1271_v48 }
 0x1b1   : >> { %v1285_v30 = vadd.f32 %v1284_v61, %v1270_v14  ;;  %v1308_v13 = vmul.f32 %v1270_v14, %v1270_v14 }
 0x1b3   : >> { %v1323_v35 = vadd.f32 %v1322_v58, %v1308_v13  ;;  %v1286_v16 = vadd.f32 %v1285_v30, %v1271_v48 }
 0x1b5   : >> { %v1324_v60 = vadd.f32 %v1323_v35, %v1309_v37 }
 0x1cd   : >> { %v1540_v45 = vpop.f32.mrb[4].mxu0 }
 0x1ce   : >> { %v1209_v19 = vpop.f32.mrb[5].mxu0  ;;  %v1273_v22 = vmax.f32 %v1540_v45, 0.0 }
 0x1cf   : >> { %v1272_v27 = vmax.f32 %v1209_v19, 0.0 }
 0x1d0   : >> { %v1311_v56 = vmul.f32 %v1273_v22, %v1273_v22 }
 0x1d1   : >> { %v1287_v33 = vadd.f32 %v1286_v16, %v1272_v27  ;;  %v1310_v9 = vmul.f32 %v1272_v27, %v1272_v27 }
 0x1d3   : >> { %v1325_v54 = vadd.f32 %v1324_v60, %v1310_v9  ;;  %v1288_v17 = vadd.f32 %v1287_v33, %v1273_v22 }
 0x1d5   : >> { %v1326_v20 = vadd.f32 %v1325_v54, %v1311_v56 }
 0x1ec   : >> { %v1543_v31 = vpop.f32.mrb[6].mxu0 }
 0x1ed   : >> { %v1219_v29 = vpop.f32.mrb[7].mxu0  ;;  %v1275_v7 = vmax.f32 %v1543_v31, 0.0 }
 0x1ee   : >> { %v1274_v18 = vmax.f32 %v1219_v29, 0.0 }
 0x1ef   : >> { %v1313_v59 = vmul.f32 %v1275_v7, %v1275_v7 }
 0x1f0   : >> { %v1289_v39 = vadd.f32 %v1288_v17, %v1274_v18  ;;  %v1312_v23 = vmul.f32 %v1274_v18, %v1274_v18 }
 0x1f2   : >> { %v1290_v26 = vadd.f32 %v1289_v39, %v1275_v7  ;;  %v1327_v28 = vadd.f32 %v1326_v20, %v1312_v23 }
 0x1f4   : >> { %v1328_v40 = vadd.f32 %v1327_v28, %v1313_v59 }
 0x20c   : >> { %v1546_v41 = vpop.f32.mrb[0].mxu1 }
 0x20d   : >> { %v1229_v63 = vpop.f32.mrb[1].mxu1  ;;  %v1277_v10 = vmax.f32 %v1546_v41, 0.0 }
 0x20e   : >> { %v1276_v55 = vmax.f32 %v1229_v63, 0.0 }
 0x20f   : >> { %v1315_v32 = vmul.f32 %v1277_v10, %v1277_v10 }
 0x210   : >> { %v1291_v42 = vadd.f32 %v1290_v26, %v1276_v55  ;;  %v1314_v43 = vmul.f32 %v1276_v55, %v1276_v55 }
 0x212   : >> { %v1329_v47 = vadd.f32 %v1328_v40, %v1314_v43  ;;  %v1292_v57 = vadd.f32 %v1291_v42, %v1277_v10 }
 0x214   : >> { %v1330_v36 = vadd.f32 %v1329_v47, %v1315_v32 }
 0x22c   : >> { %v1549_v21 = vpop.f32.mrb[2].mxu1 }
 0x22d   : >> { %v1239_v8 = vpop.f32.mrb[3].mxu1  ;;  %v1279_v34 = vmax.f32 %v1549_v21, 0.0 }
 0x22e   : >> { %v1278_v44 = vmax.f32 %v1239_v8, 0.0 }
 0x22f   : >> { %v1317_v25 = vmul.f32 %v1279_v34, %v1279_v34 }
 0x230   : >> { %v1293_v49 = vadd.f32 %v1292_v57, %v1278_v44  ;;  %v1316_v52 = vmul.f32 %v1278_v44, %v1278_v44 }
 0x232   : >> { %v1331_v50 = vadd.f32 %v1330_v36, %v1316_v52  ;;  %v1294_v51 = vadd.f32 %v1293_v49, %v1279_v34 }
 0x234   : >> { %v1332_v53 = vadd.f32 %v1331_v50, %v1317_v25 }
 0x24c   : >> { %v1552_v15 = vpop.f32.mrb[4].mxu1 }
 0x24d   : >> { %v1249_v11 = vpop.f32.mrb[5].mxu1  ;;  %v1281_v46 = vmax.f32 %v1552_v15, 0.0 }
 0x24e   : >> { %v1280_v12 = vmax.f32 %v1249_v11, 0.0 }
 0x24f   : >> { %v1319_v58 = vmul.f32 %v1281_v46, %v1281_v46 }
 0x250   : >> { %v1295_v61 = vadd.f32 %v1294_v51, %v1280_v12  ;;  %v1318_v62 = vmul.f32 %v1280_v12, %v1280_v12 }
 0x252   : >> { %v1333_v24 = vadd.f32 %v1332_v53, %v1318_v62  ;;  %v1296_v38 = vadd.f32 %v1295_v61, %v1281_v46 }
 0x254   : >> { %v1334_v48 = vadd.f32 %v1333_v24, %v1319_v58 }
 0x259   : >> { %v1555_v14 = vpop.f32.mrb[6].mxu1 }
 0x25a   : >> { %v1259_v30 = vpop.f32.mrb[7].mxu1  ;;  %v1283_v13 = vmax.f32 %v1555_v14, 0.0 }
 0x25b   : >> { %v1282_v37 = vmax.f32 %v1259_v30, 0.0 }
 0x25c   : >> { %v1321_v60 = vmul.f32 %v1283_v13, %v1283_v13 }
 0x25d   : >> { %v1297_v35 = vadd.f32 %v1296_v38, %v1282_v37  ;;  %v1320_v16 = vmul.f32 %v1282_v37, %v1282_v37 }
 0x25f   : >> { %v1298_v45 = vadd.f32 %v1297_v35, %v1283_v13  ;;  %v1335_v19 = vadd.f32 %v1334_v48, %v1320_v16 }
 0x261   : >> { %v1299_v22 = vrot.slane %v1298_v45, 4  ;;  %v1336_v27 = vadd.f32 %v1335_v19, %v1321_v60 }
 0x263   : >> { %v1300_v33 = vadd.f32 %v1299_v22, %v1298_v45  ;;  %v1337_v9 = vrot.slane %v1336_v27, 4 }
 0x265   : >> { %v1301_v56 = vrot.slane %v1300_v33, 2  ;;  %v1338_v54 = vadd.f32 %v1337_v9, %v1336_v27 }
 0x267   : >> { %v1302_v17 = vadd.f32 %v1301_v56, %v1300_v33  ;;  %v1339_v20 = vrot.slane %v1338_v54, 2 }
 0x269   : >> { %v1303_v31 = vrot.slane %v1302_v17, 1  ;;  %v1340_v29 = vadd.f32 %v1339_v20, %v1338_v54 }
 0x26b   : >> { %v1304_v7 = vadd.f32 %v1303_v31, %v1302_v17  ;;  %v1341_v18 = vrot.slane %v1340_v29, 1  ;;  %151 = sbr.rel (!%p149_p4) target bundleno = 17 (0x11), region = 68 }
 0x26d   : >> { %v1305_v39 = vadd.f32 %v1637_v6, %v1304_v7   ;;  %v1342_v23 = vadd.f32 %v1341_v18, %v1340_v29 }
 0x26f   : >> { %v1343_v59 = vadd.f32 %v1633_v5, %v1342_v23   ;;  %v2339_v6 = vmov %v1305_v39 }
 0x271   : >> { %v2338_v5 = vmov %v1343_v59  ;;  %v1345_v26 = vsel (%p149_p4), %vm1344_vm12, %v1305_v39, %v1343_v59 }
 0x272   : > { %1346 = vst [vmem:[%s1702_s25] sm:$0x3] %v1345_v26 }
 0x273 PF: > { %s12_s9 = sadd.s32 1, %s1629_s9  }
 0x274   : > { %p9_p5 = scmp.ge.s32.totalorder %s12_s9, 4  }
 0x276   :  { %11 = sbr.rel (!%p9_p5) target bundleno = 1 (0x1), region = 79 }

// kernel: conv_with_activation.3
= control target key start
LH: loop header
LB: loop body
LE: loop exit
PB: predicated region body
PF: predicated region fallthrough
CT: control target
= control target key end

     0   :  { %s1702_s15 = smov 0   ;;  %s2588_s0 = inlined_call_operand.vmem [shape: f32[2,18,18,4], index: 0, kind: input, shape index: {}]   ;;  %s2589_s1 = inlined_call_operand.vmem [shape: f32[36,128], index: 1, kind: input, shape index: {}]   ;;  %s2590_s2 = inlined_call_operand.vmem [shape: f32[1,128], index: 2, kind: input, shape index: {}]   ;;  %s2591_s3 = inlined_call_operand.vmem [shape: f32[1,128], index: 3, kind: input, shape index: {}]   ;;  %s2592_s4 = inlined_call_operand.vmem [shape: f32[2,256,8], index: 4, kind: output, shape index: {}]  }
   0x1 LB: > { %s1474_s16 = sadd.s32 4294967295, %s1663_s15   ;;  %p1478_p0 = scmp.ge.s32.totalorder %s1663_s15, 1  ;;  %s1663_s15 = sphi %s1702_s15, %s14_s15  }
   0x2   : > { %p162_p1 = scmp.lt.s32.totalorder %s1663_s15, 3 }
   0x4   : > { %p163_p2 = pnand %p1478_p0, %p162_p1 }
   0x5   : > { %p188_p3 = scmp.lt.s32.totalorder (!%p163_p2), %s1474_s16, 1  ;;  %v1713_v0 = vld [vmem:[%s2589_s1] sm:$0xff] (!%p163_p2)  ;;  %v1718_v1 = vld [vmem:[%s2589_s1 + $0x8] sm:$0xff] (!%p163_p2)  ;;  %v1723_v2 = vld [vmem:[%s2589_s1 + $0x10] sm:$0xff] (!%p163_p2)  ;;  %s1755_s13 = smov (!%p163_p2), 0  }
   0x6   : > { %166 = sbr.rel (%p163_p2) target bundleno = 613 (0x265), region = 36  ;;  %2600 = vst [vmem:[#allocation2_spill] sm:$0xff] (!%p163_p2), %v1713_v0  ;;  %2601 = vst [vmem:[#allocation3_spill] sm:$0xff] (!%p163_p2), %v1718_v1  ;;  %v1728_v3 = vld [vmem:[%s2589_s1 + $0x18] sm:$0xff] (!%p163_p2)  ;;  %v1733_v4 = vld [vmem:[%s2589_s1 + $0x20] sm:$0xf] (!%p163_p2) }
   0x7   : > { %2602 = vst [vmem:[#allocation4_spill] sm:$0xff] (!%p163_p2), %v1723_v2  ;;  %2603 = vst [vmem:[#allocation5_spill] sm:$0xff] (!%p163_p2), %v1728_v3  ;;  %v1738_v5 = vld [vmem:[%s2590_s2] ss:$0 sm:$0xff] (!%p163_p2) }
   0x8   : > { %2604 = vst [vmem:[#allocation6_spill] sm:$0xff] (!%p163_p2), %v1733_v4  ;;  %2605 = vst [vmem:[#allocation7_spill] sm:$0xff] (!%p163_p2), %v1738_v5  ;;  %v1743_v6 = vld [vmem:[%s2591_s3] ss:$0 sm:$0xff] (!%p163_p2) }
   0x9   : > { %2606 = vst [vmem:[#allocation8_spill] sm:$0xff] (!%p163_p2), %v1743_v6 }
   0xd   : > { %s2623_s16 = smov (!%p188_p3, %s1474_s16), 1 }
   0xe   : > { %s1628_s5 = smul.u32 432, %s2623_s16  ;;  %s1558_s6 = sshll.u32 %s2623_s16, 8 }
   0xf   : > { %s1748_s9 = scalar_lea.vmem %s2592_s4, %s1558_s6 }
  0x10   : > { %s1753_s12 = scalar_lea.vmem %s2588_s0, %s1628_s5 }
  0x11 LB: >> { %v2607_v4 = vld [vmem:[#allocation6_spill] sm:$0xff]  ;;  %s1483_s14 = smul.u32 192, %s1667_s13  ;;  %vm262_vm0 = vcmask 1046528   ;;  %s1669_s17 = smov 4   ;;  %vm303_vm1 = vcmask 1045504   ;;  %v2609_v1 = vld [vmem:[#allocation3_spill] sm:$0xff]  ;;  %s1667_s13 = sphi %s1755_s13, %s210_s13  }
  0x12   : >> { %s1670_s18 = smov 8   ;;  %s1671_s19 = smov 12   ;;  %v2608_v0 = vld [vmem:[#allocation2_spill] sm:$0xff]  ;;  %v2610_v2 = vld [vmem:[#allocation4_spill] sm:$0xff]  ;;  %v2611_v3 = vld [vmem:[#allocation5_spill] sm:$0xff]  ;;  %vm1175_vm2 = vcmask 1043456  }
  0x13   : >> { %s1762_s16 = scalar_lea.vmem %s1753_s12, %s1483_s14  ;;  %s1672_s20 = smov 16   ;;  %vm990_vm3 = vcmask 31744   ;;  %vm1007_vm4 = vcmask 64512   ;;  %vm1024_vm5 = vcmask 97280   ;;  %vm1041_vm6 = vcmask 130048  }
  0x14   : >> { %v1765_v7 = vld [vmem:[%s1762_s16 + $0x8] sm:$0xff]  ;;  %v216_v8 = vld [vmem:[%s1762_s16 + $0x10] sm:$0x3]  ;;  %v1769_v9 = vld [vmem:[%s1762_s16] sm:$0xff]  ;;  %s1673_s21 = smov 20   ;;  %s1674_s22 = smov 24  }
  0x15   : >> { %v264_v10 = vrot.slane %v1765_v7, 1  ;;  %v266_v11 = vrot.slane %v216_v8, 1  ;;  %v263_v12 = vrot.slane %v1769_v9, 1  ;;  %v1774_v13 = vld [vmem:[%s1762_s16 + $0x68] sm:$0xff]  ;;  %v228_v14 = vld [vmem:[%s1762_s16 + $0x70] sm:$0x3] }
  0x16   : >> { %v1778_v15 = vrot.slane %v1774_v13, 1  ;;  %v286_v16 = vrot.slane %v228_v14, 1  ;;  %v1781_v17 = vld [vmem:[%s1762_s16 + $0x60] sm:$0xff]  ;;  %v1789_v21 = vrot.slane %v1774_v13, 2  ;;  %v304_v22 = vrot.slane %v1769_v9, 2  ;;  %v1817_v33 = vld [vmem:[%s1762_s16 + $0x78] sm:$0xff] }
  0x17   : >> { %v267_v18 = vsel %vm262_vm0, %v264_v10, %v266_v11  ;;  %v265_v19 = vsel %vm262_vm0, %v263_v12, %v264_v10  ;;  %v283_v20 = vrot.slane %v1781_v17, 1  ;;  %v324_v25 = vrot.slane %v1781_v17, 2  ;;  %v1820_v34 = vld [vmem:[%s1762_s16 + $0x18] sm:$0xff]  ;;  %v1823_v35 = vld [vmem:[%s1762_s16 + $0x80] sm:$0xff]  ;;  %v1500_v43 = vld [vmem:[%s1762_s16 + $0x88] sm:$0x3] }
  0x18   : >> { %608 = vrot.lane.b32.xlu1 %v267_v18, %s1669_s17  ;;  %606 = vrot.lane.b32.xlu0 %v265_v19, %s1669_s17  ;;  %v287_v23 = vsel %vm262_vm0, %v1778_v15, %v286_v16  ;;  %v305_v26 = vrot.slane %v1765_v7, 2  ;;  %v327_v29 = vrot.slane %v228_v14, 2  ;;  %v307_v30 = vrot.slane %v216_v8, 2  ;;  %v1826_v36 = vld [vmem:[%s1762_s16 + $0x20] sm:$0xff]  ;;  %v1488_v44 = vld [vmem:[%s1762_s16 + $0x28] sm:$0x3] }
  0x19   : >> { %v1796_v24 = vsel %vm262_vm0, %v283_v20, %v1778_v15  ;;  %v1805_v27 = vsel %vm303_vm1, %v324_v25, %v1789_v21  ;;  %v415_v37 = vrot.slane %v1817_v33, 1  ;;  %v395_v38 = vrot.slane %v1820_v34, 1  ;;  %v231_v53 = vld [vmem:[%s1762_s16 + $0x88] sm:$0x3]  ;;  %v1873_v10 = vld [vmem:[%s1762_s16 + $0x90] sm:$0xff]  ;;  %v1887_v19 = vld [vmem:[%s1762_s16 + $0x98] sm:$0xff] }
  0x1a   : >> { %v306_v28 = vsel %vm303_vm1, %v304_v22, %v305_v26  ;;  %v328_v31 = vsel %vm303_vm1, %v1789_v21, %v327_v29  ;;  %v308_v32 = vsel %vm303_vm1, %v305_v26, %v307_v30  ;;  %v416_v39 = vrot.slane %v1823_v35, 1  ;;  %v219_v54 = vld [vmem:[%s1762_s16 + $0x28] sm:$0x3]  ;;  %v1876_v11 = vld [vmem:[%s1762_s16 + $0x30] sm:$0xff]  ;;  %v1890_v20 = vld [vmem:[%s1762_s16 + $0x38] sm:$0xff]  ;;  %s1675_s23 = smov 28  }
  0x1b   : >> { %v396_v40 = vrot.slane %v1826_v36, 1  ;;  %v418_v45 = vrot.slane %v1500_v43, 1  ;;  %v398_v46 = vrot.slane %v1488_v44, 1  ;;  %v455_v47 = vrot.slane %v1817_v33, 2  ;;  %v1526_v30 = vld [vmem:[%s1762_s16 + $0xa0] sm:$0x3] }
  0x1c   : >> { %624 = vrot.lane.b32.xlu1 %v287_v23, %s1669_s17  ;;  %622 = vrot.lane.b32.xlu0 %v1796_v24, %s1669_s17  ;;  %v417_v41 = vsel %vm262_vm0, %v415_v37, %v416_v39  ;;  %v435_v48 = vrot.slane %v1820_v34, 2  ;;  %v456_v49 = vrot.slane %v1823_v35, 2  ;;  %v436_v50 = vrot.slane %v1826_v36, 2  ;;  %s1676_s24 = smov 32   ;;  %s1555_s25 = sshll.u32 %s1667_s13, 7 }
  0x1d   : >> { %v397_v42 = vsel %vm262_vm0, %v395_v38, %v396_v40  ;;  %v419_v51 = vsel %vm262_vm0, %v416_v39, %v418_v45  ;;  %v399_v52 = vsel %vm262_vm0, %v396_v40, %v398_v46  ;;  %v291_v57 = vrot.slane %v231_v53, 1  ;;  %s2518_s26 = scalar_lea.vmem %s1748_s9, %s1555_s25  ;;  %s210_s13 = sadd.s32 1, %s1667_s13  }
  0x1e   : >> { %v457_v55 = vsel %vm303_vm1, %v455_v47, %v456_v49  ;;  %v437_v56 = vsel %vm303_vm1, %v435_v48, %v436_v50  ;;  %v271_v58 = vrot.slane %v219_v54, 1  ;;  %v458_v61 = vrot.slane %v1500_v43, 2  ;;  %v1503_v48 = vld [vmem:[%s1762_s16 + $0xa0] sm:$0x3]  ;;  %p207_p4 = scmp.ge.s32.totalorder %s210_s13, 2  }
  0x1f   : >> { %v292_v59 = vsel %vm262_vm0, %v416_v39, %v291_v57  ;;  %v438_v62 = vrot.slane %v1488_v44, 2  ;;  %v332_v12 = vrot.slane %v231_v53, 2  ;;  %v312_v14 = vrot.slane %v219_v54, 2  ;;  %v222_v57 = vld [vmem:[%s1762_s16 + $0x40] sm:$0x3] }
  0x20   : >> { %670 = vrot.lane.b32.xlu1 %v1805_v27, %s1670_s18  ;;  %654 = vrot.lane.b32.xlu0 %v306_v28, %s1670_s18  ;;  %v272_v60 = vsel %vm262_vm0, %v396_v40, %v271_v58  ;;  %v459_v63 = vsel %vm303_vm1, %v456_v49, %v458_v61  ;;  %v546_v22 = vrot.slane %v1873_v10, 1  ;;  %v526_v23 = vrot.slane %v1876_v11, 1 }
  0x21   : >> { %v439_v8 = vsel %vm303_vm1, %v436_v50, %v438_v62  ;;  %v333_v16 = vsel %vm303_vm1, %v456_v49, %v332_v12  ;;  %v313_v18 = vsel %vm303_vm1, %v436_v50, %v312_v14  ;;  %v1899_v25 = vrot.slane %v1887_v19, 1  ;;  %v1491_v49 = vld [vmem:[%s1762_s16 + $0x40] sm:$0x3] }
  0x22   : >> { %v1902_v26 = vrot.slane %v1890_v20, 1  ;;  %v586_v38 = vrot.slane %v1873_v10, 2  ;;  %v566_v39 = vrot.slane %v1876_v11, 2  ;;  %v1923_v40 = vrot.slane %v1887_v19, 2 }
  0x23   : >> { %v548_v28 = vsel %vm262_vm0, %v546_v22, %v1899_v25  ;;  %v1614_v44 = vpack.c.bf16 %v2609_v1, %v2608_v0  ;;  %v1618_v47 = vpack.c.bf16 %v2611_v3, %v2610_v2  ;;  %v423_v50 = vrot.slane %v1503_v48, 1  ;;  %v1988_v22 = vld [vmem:[%s1762_s16 + $0x48] sm:$0xff] }
  0x24   : >> { %672 = vrot.lane.b32.xlu1 %v328_v31, %s1670_s18  ;;  %656 = vrot.lane.b32.xlu0 %v308_v32, %s1670_s18  ;;  %v528_v29 = vsel %vm262_vm0, %v526_v23, %v1902_v26  ;;  %v1514_v31 = vld [vmem:[%s1762_s16 + $0x40] sm:$0x3]  ;;  %v549_v32 = vrot.slane %v1526_v30, 1  ;;  %v588_v45 = vsel %vm303_vm1, %v586_v38, %v1923_v40  ;;  %v589_v54 = vrot.slane %v1526_v30, 2  ;;  %2613 = vst [vmem:[#allocation10_spill] sm:$0xff] %v1988_v22 }
  0x25   : >> { %v529_v37 = vrot.slane %v1514_v31, 1  ;;  %1615 = vmatprep.subr.bf16.mxu0 %v1614_v44  ;;  %1622 = vmatprep.subr.bf16.mxu1 %v1614_v44  ;;  %v276_v61 = vrot.slane %v222_v57, 1  ;;  %v443_v12 = vrot.slane %v1491_v49, 2  ;;  %vm1058_vm7 = vcmask 162816  }
  0x26   : >> { %1617 = vmatpush3.bf16.msra.mxu0 %v1614_v44  ;;  %1625 = vmatpush3.bf16.msra.mxu1 %v1614_v44  ;;  %v590_v58 = vsel %vm303_vm1, %v1923_v40, %v589_v54  ;;  %v1517_v54 = vld [vmem:[%s1762_s16 + $0x58] sm:$0x3]  ;;  %vm1075_vm8 = vcmask 195584   ;;  %vm1092_vm9 = vcmask 228352   ;;  %vm1109_vm10 = vcmask 261120  }
  0x27   : >> { %v530_v43 = vsel %vm262_vm0, %v1902_v26, %v529_v37  ;;  %1619 = vmatprep.subr.bf16.mxu0 %v1618_v47  ;;  %1623 = vmatprep.subr.bf16.mxu1 %v1618_v47  ;;  %v574_v2 = vrot.slane %v1517_v54, 2  ;;  %vm1126_vm11 = vcmask 293888  }
  0x28   : >> { %718 = vrot.lane.b32.xlu1 %v1817_v33, %s1671_s19  ;;  %702 = vrot.lane.b32.xlu0 %v1820_v34, %s1671_s19 }
  0x2a   : >> { %1621 = vmatpush3.bf16.msra.mxu0 %v1618_v47  ;;  %1626 = vmatpush3.bf16.msra.mxu1 %v1618_v47 }
  0x2b   : >> { %1588 = vmatprep.subr.msk.mxu0 %vm1175_vm2, %v2607_v4  ;;  %1624 = vmatprep.subr.msk.mxu1 %vm1175_vm2, %v2607_v4 }
  0x2c   : >> { %720 = vrot.lane.b32.xlu1 %v1823_v35, %s1671_s19  ;;  %704 = vrot.lane.b32.xlu0 %v1826_v36, %s1671_s19 }
  0x2e   : >> { %1589 = vmatpush3.msk.msra.mxu0 %vm1175_vm2, %v2607_v4  ;;  %1627 = vmatpush3.msk.msra.mxu1 %vm1175_vm2, %v2607_v4  ;;  %v237_v4 = vld [vmem:[%s1762_s16 + $0xb8] sm:$0x3] }
  0x2f   : >> { %v301_v6 = vrot.slane %v237_v4, 1 }
  0x30   : >> { %766 = vrot.lane.b32.xlu1 %v417_v41, %s1672_s20  ;;  %750 = vrot.lane.b32.xlu0 %v397_v42, %s1672_s20 }
  0x34   : >> { %626 = vrot.lane.b32.xlu1 %v417_v41, %s1669_s17  ;;  %610 = vrot.lane.b32.xlu0 %v397_v42, %s1669_s17  ;;  %v1928_v41 = vrot.slane %v1890_v20, 2  ;;  %v550_v42 = vsel %vm262_vm0, %v1899_v25, %v549_v32 }
  0x36   : >> { %v568_v46 = vsel %vm303_vm1, %v566_v39, %v1928_v41  ;;  %v2013_v39 = vld [vmem:[%s1762_s16 + $0xb0] sm:$0xff] }
  0x37   : >> { %2614 = vst [vmem:[#allocation11_spill] sm:$0xff] %v2013_v39 }
  0x38   : >> { %768 = vrot.lane.b32.xlu1 %v419_v51, %s1672_s20  ;;  %752 = vrot.lane.b32.xlu0 %v399_v52, %s1672_s20  ;;  %v403_v51 = vrot.slane %v1491_v49, 1  ;;  %v424_v52 = vsel %vm262_vm0, %v1899_v25, %v423_v50 }
  0x3a   : >> { %v404_v53 = vsel %vm262_vm0, %v1902_v26, %v403_v51 }
  0x3c   : >> { %814 = vrot.lane.b32.xlu1 %v457_v55, %s1673_s21  ;;  %798 = vrot.lane.b32.xlu0 %v437_v56, %s1673_s21 }
  0x40   : >> { %628 = vrot.lane.b32.xlu1 %v292_v59, %s1669_s17  ;;  %612 = vrot.lane.b32.xlu0 %v272_v60, %s1669_s17 }
  0x44   : >> { %674 = vrot.lane.b32.xlu1 %v457_v55, %s1670_s18  ;;  %658 = vrot.lane.b32.xlu0 %v437_v56, %s1670_s18  ;;  %v569_v55 = vrot.slane %v1514_v31, 2  ;;  %v234_v56 = vld [vmem:[%s1762_s16 + $0xa0] sm:$0x3] }
  0x45   : >> { %v296_v60 = vrot.slane %v234_v56, 1  ;;  %v337_v23 = vrot.slane %v234_v56, 2  ;;  %v534_v56 = vrot.slane %v1517_v54, 1 }
  0x46   : >> { %v570_v59 = vsel %vm303_vm1, %v1928_v41, %v569_v55 }
  0x47   : >> { %v297_v62 = vsel %vm262_vm0, %v1899_v25, %v296_v60  ;;  %v317_v25 = vrot.slane %v222_v57, 2  ;;  %v571_v60 = vrot.slane %v1988_v22, 2 }
  0x48   : >> { %816 = vrot.lane.b32.xlu1 %v459_v63, %s1673_s21  ;;  %800 = vrot.lane.b32.xlu0 %v439_v8, %s1673_s21  ;;  %v277_v63 = vsel %vm262_vm0, %v1902_v26, %v276_v61  ;;  %v463_v8 = vrot.slane %v1503_v48, 2  ;;  %v2067_v61 = vrot.slane %v2013_v39, 2 }
  0x49   : >> { %v318_v30 = vsel %vm303_vm1, %v1928_v41, %v317_v25 }
  0x4a   : >> { %v464_v14 = vsel %vm303_vm1, %v1923_v40, %v463_v8 }
  0x4c   : >> { %862 = vrot.lane.b32.xlu1 %v1873_v10, %s1674_s22  ;;  %846 = vrot.lane.b32.xlu0 %v1876_v11, %s1674_s22 }
  0x50   : >> { %676 = vrot.lane.b32.xlu1 %v333_v16, %s1670_s18  ;;  %660 = vrot.lane.b32.xlu0 %v313_v18, %s1670_s18  ;;  %v444_v16 = vsel %vm303_vm1, %v1928_v41, %v443_v12  ;;  %v1985_v18 = vld [vmem:[%s1762_s16 + $0xa8] sm:$0xff]  ;;  %v531_v41 = vrot.slane %v1988_v22, 1 }
  0x51   : >> { %2612 = vst [vmem:[#allocation9_spill] sm:$0xff] %v1985_v18 }
  0x54   : >> { %722 = vrot.lane.b32.xlu1 %v1873_v10, %s1671_s19  ;;  %706 = vrot.lane.b32.xlu0 %v1876_v11, %s1671_s19 }
  0x58   : >> { %864 = vrot.lane.b32.xlu1 %v1887_v19, %s1674_s22  ;;  %848 = vrot.lane.b32.xlu0 %v1890_v20, %s1674_s22 }
  0x5c   : >> { %910 = vrot.lane.b32.xlu1 %v548_v28, %s1675_s23  ;;  %894 = vrot.lane.b32.xlu0 %v528_v29, %s1675_s23 }
  0x60   : >> { %724 = vrot.lane.b32.xlu1 %v1887_v19, %s1671_s19  ;;  %708 = vrot.lane.b32.xlu0 %v1890_v20, %s1671_s19 }
  0x64   : >> { %770 = vrot.lane.b32.xlu1 %v548_v28, %s1672_s20  ;;  %754 = vrot.lane.b32.xlu0 %v528_v29, %s1672_s20 }
  0x68   : >> { %912 = vrot.lane.b32.xlu1 %v550_v42, %s1675_s23  ;;  %896 = vrot.lane.b32.xlu0 %v530_v43, %s1675_s23  ;;  %v2016_v42 = vld [vmem:[%s1762_s16 + $0x50] sm:$0xff]  ;;  %v2025_v43 = vrot.slane %v2013_v39, 1 }
  0x69   : >> { %2615 = vst [vmem:[#allocation12_spill] sm:$0xff] %v2016_v42  ;;  %v2028_v44 = vrot.slane %v2016_v42, 1 }
  0x6a   : >> { %v302_v54 = vsel %vm262_vm0, %v2025_v43, %v301_v6 }
  0x6b   : >> { %v533_v48 = vsel %vm262_vm0, %v531_v41, %v2028_v44  ;;  %v535_v8 = vsel %vm262_vm0, %v2028_v44, %v534_v56 }
  0x6c   : >> { %958 = vrot.lane.b32.xlu1 %v588_v45, %s1676_s24  ;;  %942 = vrot.lane.b32.xlu0 %v568_v46, %s1676_s24 }
  0x70   : >> { %630 = vrot.lane.b32.xlu1 %v548_v28, %s1669_s17  ;;  %614 = vrot.lane.b32.xlu0 %v528_v29, %s1669_s17  ;;  %v338_v29 = vsel %vm303_vm1, %v1923_v40, %v337_v23  ;;  %v551_v40 = vrot.slane %v1985_v18, 1 }
  0x72   : >> { %v553_v47 = vsel %vm262_vm0, %v551_v40, %v2025_v43  ;;  %v1494_v40 = vld [vmem:[%s1762_s16 + $0x58] sm:$0x3] }
  0x74   : >> { %772 = vrot.lane.b32.xlu1 %v424_v52, %s1672_s20  ;;  %756 = vrot.lane.b32.xlu0 %v404_v53, %s1672_s20  ;;  %v1529_v53 = vld [vmem:[%s1762_s16 + $0xb8] sm:$0x3] }
  0x75   : >> { %v554_v55 = vrot.slane %v1529_v53, 1  ;;  %v594_v1 = vrot.slane %v1529_v53, 2 }
  0x78   : >> { %818 = vrot.lane.b32.xlu1 %v588_v45, %s1673_s21  ;;  %802 = vrot.lane.b32.xlu0 %v568_v46, %s1673_s21 }
  0x7c   : >> { %960 = vrot.lane.b32.xlu1 %v590_v58, %s1676_s24  ;;  %944 = vrot.lane.b32.xlu0 %v570_v59, %s1676_s24  ;;  %v591_v59 = vrot.slane %v1985_v18, 2 }
  0x80   : >> { %632 = vrot.lane.b32.xlu1 %v297_v62, %s1669_s17  ;;  %616 = vrot.lane.b32.xlu0 %v277_v63, %s1669_s17  ;;  %v2070_v62 = vrot.slane %v2016_v42, 2  ;;  %v555_v63 = vsel %vm262_vm0, %v2025_v43, %v554_v55  ;;  %v408_v55 = vrot.slane %v1494_v40, 1 }
  0x82   : >> { %v573_v23 = vsel %vm303_vm1, %v571_v60, %v2070_v62 }
  0x84   : >> { %678 = vrot.lane.b32.xlu1 %v588_v45, %s1670_s18  ;;  %662 = vrot.lane.b32.xlu0 %v568_v46, %s1670_s18 }
  0x88   : >> { %820 = vrot.lane.b32.xlu1 %v464_v14, %s1673_s21  ;;  %804 = vrot.lane.b32.xlu0 %v444_v16, %s1673_s21  ;;  %v593_v16 = vsel %vm303_vm1, %v591_v59, %v2067_v61 }
  0x8a   : >> { %v1990_v26 = vpop.permute.xlu1 %608  ;;  %v1992_v28 = vpop.permute.xlu0 %606 }
  0x8c   : >> { %866 = vrot.lane.b32.xlu1 %v1985_v18, %s1674_s22  ;;  %850 = vrot.lane.b32.xlu0 %v1988_v22, %s1674_s22 }
  0x8e   : >> { %v2002_v31 = vpop.permute.xlu1 %624  ;;  %v2004_v32 = vpop.permute.xlu0 %622 }
  0x90   : >> { %680 = vrot.lane.b32.xlu1 %v338_v29, %s1670_s18  ;;  %664 = vrot.lane.b32.xlu0 %v318_v30, %s1670_s18  ;;  %v1506_v30 = vld [vmem:[%s1762_s16 + $0xb8] sm:$0x3] }
  0x91   : >> { %v428_v41 = vrot.slane %v1506_v30, 1 }
  0x92   : >> { %v2008_v37 = vpop.permute.xlu1 %670  ;;  %v2010_v38 = vpop.permute.xlu0 %654 }
  0x93   : >> { %v429_v60 = vsel %vm262_vm0, %v2025_v43, %v428_v41  ;;  %v595_v41 = vsel %vm303_vm1, %v2067_v61, %v594_v1 }
  0x94   : >> { %726 = vrot.lane.b32.xlu1 %v1985_v18, %s1671_s19  ;;  %710 = vrot.lane.b32.xlu0 %v1988_v22, %s1671_s19 }
  0x96   : >> { %v2030_v45 = vpop.permute.xlu1 %672  ;;  %v2032_v46 = vpop.permute.xlu0 %656 }
  0x98   : >> { %868 = vrot.lane.b32.xlu1 %v2013_v39, %s1674_s22  ;;  %852 = vrot.lane.b32.xlu0 %v2016_v42, %s1674_s22 }
  0x9a   : >> { %v2042_v49 = vpop.permute.xlu1 %718  ;;  %v2044_v50 = vpop.permute.xlu0 %702 }
  0x9c   : >> { %914 = vrot.lane.b32.xlu1 %v553_v47, %s1675_s23  ;;  %898 = vrot.lane.b32.xlu0 %v533_v48, %s1675_s23 }
  0x9e   : >> { %v2048_v51 = vpop.permute.xlu1 %720  ;;  %v2050_v52 = vpop.permute.xlu0 %704 }
  0xa0   : >> { %728 = vrot.lane.b32.xlu1 %v2013_v39, %s1671_s19  ;;  %712 = vrot.lane.b32.xlu0 %v2016_v42, %s1671_s19  ;;  %v468_v42 = vrot.slane %v1506_v30, 2  ;;  %v448_v39 = vrot.slane %v1494_v40, 2  ;;  %v2147_v30 = vld [vmem:[%s1762_s16 + $0xc0] sm:$0xff]  ;;  %v342_v40 = vrot.slane %v237_v4, 2 }
  0xa2   : >> { %v2058_v57 = vpop.permute.xlu1 %766  ;;  %v2060_v58 = vpop.permute.xlu0 %750  ;;  %v469_v6 = vsel %vm303_vm1, %v2067_v61, %v468_v42  ;;  %v449_v43 = vsel %vm303_vm1, %v2070_v62, %v448_v39  ;;  %v343_v39 = vsel %vm303_vm1, %v2067_v61, %v342_v40 }
  0xa4   : >> { %774 = vrot.lane.b32.xlu1 %v553_v47, %s1672_s20  ;;  %758 = vrot.lane.b32.xlu0 %v533_v48, %s1672_s20 }
  0xa6   : >> { %v2076_v12 = vpop.permute.xlu1 %626  ;;  %v2078_v14 = vpop.permute.xlu0 %610 }
  0xa7   : >> { %v1001_v61 = vsel %vm990_vm3, %v1817_v33, %v2076_v12 }
  0xa8   : >> { %916 = vrot.lane.b32.xlu1 %v555_v63, %s1675_s23  ;;  %900 = vrot.lane.b32.xlu0 %v535_v8, %s1675_s23  ;;  %v409_v63 = vsel %vm262_vm0, %v2028_v44, %v408_v55  ;;  %v575_v55 = vsel %vm303_vm1, %v2070_v62, %v574_v2 }
  0xaa   : >> { %v2086_v25 = vpop.permute.xlu1 %768  ;;  %v2088_v29 = vpop.permute.xlu0 %752 }
  0xac   : >> { %962 = vrot.lane.b32.xlu1 %v593_v16, %s1676_s24  ;;  %946 = vrot.lane.b32.xlu0 %v573_v23, %s1676_s24 }
  0xae   : >> { %v2094_v56 = vpop.permute.xlu1 %814  ;;  %v2096_v59 = vpop.permute.xlu0 %798 }
  0xb0   : >> { %634 = vrot.lane.b32.xlu1 %v553_v47, %s1669_s17  ;;  %618 = vrot.lane.b32.xlu0 %v533_v48, %s1669_s17  ;;  %v225_v48 = vld [vmem:[%s1762_s16 + $0x58] sm:$0x3] }
  0xb2   : >> { %v2104_v8 = vpop.permute.xlu1 %628  ;;  %v2106_v0 = vpop.permute.xlu0 %612 }
  0xb4   : >> { %776 = vrot.lane.b32.xlu1 %v429_v60, %s1672_s20  ;;  %760 = vrot.lane.b32.xlu0 %v409_v63, %s1672_s20  ;;  %v281_v60 = vrot.slane %v225_v48, 1 }
  0xb6   : >> { %v675_v3 = vpop.permute.xlu1 %674  ;;  %v659_v47 = vpop.permute.xlu0 %658  ;;  %v282_v63 = vsel %vm262_vm0, %v2028_v44, %v281_v60 }
  0xb7   : >> { %v1018_v40 = vsel %vm1007_vm4, %v1001_v61, %v675_v3  ;;  %v991_v3 = vsel %vm990_vm3, %v1769_v9, %v1992_v28 }
  0xb8   : >> { %822 = vrot.lane.b32.xlu1 %v593_v16, %s1673_s21  ;;  %806 = vrot.lane.b32.xlu0 %v573_v23, %s1673_s21 }
  0xba   : >> { %v2118_v5 = vpop.permute.xlu1 %816  ;;  %v2120_v53 = vpop.permute.xlu0 %800 }
  0xbc   : >> { %964 = vrot.lane.b32.xlu1 %v595_v41, %s1676_s24  ;;  %948 = vrot.lane.b32.xlu0 %v575_v55, %s1676_s24 }
  0xbe   : >> { %v2128_v1 = vpop.permute.xlu1 %862  ;;  %v2130_v2 = vpop.permute.xlu0 %846 }
  0xc0   : >> { %636 = vrot.lane.b32.xlu1 %v302_v54, %s1669_s17  ;;  %620 = vrot.lane.b32.xlu0 %v282_v63, %s1669_s17  ;;  %v322_v54 = vrot.slane %v225_v48, 2 }
  0xc2   : >> { %v2134_v41 = vpop.permute.xlu1 %676  ;;  %v2136_v55 = vpop.permute.xlu0 %660  ;;  %v323_v42 = vsel %vm303_vm1, %v2070_v62, %v322_v54  ;;  %v993_v62 = vsel %vm990_vm3, %v1820_v34, %v2078_v14 }
  0xc3   : >> { %v1010_v54 = vsel %vm1007_vm4, %v993_v62, %v659_v47  ;;  %v999_v47 = vsel %vm990_vm3, %v1781_v17, %v2004_v32 }
  0xc4   : >> { %682 = vrot.lane.b32.xlu1 %v593_v16, %s1670_s18  ;;  %666 = vrot.lane.b32.xlu0 %v573_v23, %s1670_s18 }
  0xc6   : >> { %v723_v44 = vpop.permute.xlu1 %722  ;;  %v707_v60 = vpop.permute.xlu0 %706 }
  0xc7   : >> { %v1035_v33 = vsel %vm1024_vm5, %v1018_v40, %v723_v44  ;;  %v1027_v34 = vsel %vm1024_vm5, %v1010_v54, %v707_v60  ;;  %v1016_v44 = vsel %vm1007_vm4, %v999_v47, %v2008_v37  ;;  %v1008_v60 = vsel %vm1007_vm4, %v991_v3, %v2010_v38 }
  0xc8   : >> { %824 = vrot.lane.b32.xlu1 %v469_v6, %s1673_s21  ;;  %808 = vrot.lane.b32.xlu0 %v449_v43, %s1673_s21  ;;  %v2168_v43 = vld [vmem:[%s1762_s16 + $0xc8] sm:$0xff]  ;;  %v1033_v28 = vsel %vm1024_vm5, %v1016_v44, %v2042_v49  ;;  %v596_v3 = vrot.slane %v2147_v30, 2 }
  0xc9   : >> { %v1050_v37 = vsel %vm1041_vm6, %v1033_v28, %v2058_v57 }
  0xca   : >> { %v2149_v16 = vpop.permute.xlu1 %864  ;;  %v2151_v23 = vpop.permute.xlu0 %848  ;;  %v1067_v49 = vsel %vm1058_vm7, %v1050_v37, %v2094_v56 }
  0xcb   : >> { %v1084_v57 = vsel %vm1075_vm8, %v1067_v49, %v2128_v1 }
  0xcc   : >> { %870 = vrot.lane.b32.xlu1 %v2147_v30, %s1674_s22  ;;  %854 = vrot.lane.b32.xlu0 %v1781_v17, %s1674_s22 }
  0xce   : >> { %v911_v63 = vpop.permute.xlu1 %910  ;;  %v895_v6 = vpop.permute.xlu0 %894 }
  0xcf   : >> { %v1101_v62 = vsel %vm1092_vm9, %v1084_v57, %v911_v63 }
  0xd0   : >> { %684 = vrot.lane.b32.xlu1 %v343_v39, %s1670_s18  ;;  %668 = vrot.lane.b32.xlu0 %v323_v42, %s1670_s18  ;;  %v556_v39 = vrot.slane %v2147_v30, 1  ;;  %v2184_v42 = vrot.slane %v2168_v43, 1 }
  0xd2   : >> { %v2163_v4 = vpop.permute.xlu1 %724  ;;  %v2165_v48 = vpop.permute.xlu0 %708  ;;  %v558_v9 = vsel %vm262_vm0, %v556_v39, %v2184_v42 }
  0xd4   : >> { %730 = vrot.lane.b32.xlu1 %v2147_v30, %s1671_s19  ;;  %714 = vrot.lane.b32.xlu0 %v1781_v17, %s1671_s19  ;;  %v1025_v17 = vsel %vm1024_vm5, %v1008_v60, %v2044_v50  ;;  %v2268_v60 = vrot.slane %v2168_v43, 2  ;;  %v1509_v30 = vld [vmem:[%s1762_s16 + $0xd0] sm:$0x3] }
  0xd5   : >> { %v1042_v38 = vsel %vm1041_vm6, %v1025_v17, %v2060_v58 }
  0xd6   : >> { %v771_v12 = vpop.permute.xlu1 %770  ;;  %v755_v14 = vpop.permute.xlu0 %754  ;;  %v1059_v50 = vsel %vm1058_vm7, %v1042_v38, %v2096_v59  ;;  %v2236_v59 = vld [vmem:[%s1762_s16 + $0xd0] sm:$0x3]  ;;  %v598_v37 = vsel %vm303_vm1, %v596_v3, %v2268_v60  ;;  %v433_v38 = vrot.slane %v1509_v30, 1 }
  0xd7   : >> { %v2189_v22 = vsel %vm1041_vm6, %v1035_v33, %v771_v12  ;;  %v2192_v18 = vsel %vm1041_vm6, %v1027_v34, %v755_v14  ;;  %v1076_v58 = vsel %vm1075_vm8, %v1059_v50, %v2130_v2  ;;  %v2241_v34 = vld [vmem:[%s1762_s16 + $0x70] sm:$0x3]  ;;  %v559_v1 = vrot.slane %v2236_v59, 1 }
  0xd8   : >> { %872 = vrot.lane.b32.xlu1 %v2168_v43, %s1674_s22  ;;  %856 = vrot.lane.b32.xlu0 %v1774_v13, %s1674_s22  ;;  %v1093_v56 = vsel %vm1092_vm9, %v1076_v58, %v895_v6  ;;  %v539_v6 = vrot.slane %v2241_v34, 1  ;;  %v1002_v12 = vsel %vm990_vm3, %v1823_v35, %v2104_v8  ;;  %v994_v14 = vsel %vm990_vm3, %v1826_v36, %v2106_v0 }
  0xd9   : >> { %v1019_v47 = vsel %vm1007_vm4, %v1002_v12, %v2134_v41  ;;  %v1011_v44 = vsel %vm1007_vm4, %v994_v14, %v2136_v55  ;;  %v560_v0 = vsel %vm262_vm0, %v2184_v42, %v559_v1  ;;  %v1533_v12 = vld [vmem:[%s1762_s16 + $0xd8] sm:$0xff] }
  0xda   : >> { %v2214_v32 = vpop.permute.xlu1 %912  ;;  %v2216_v61 = vpop.permute.xlu0 %896  ;;  %v1036_v35 = vsel %vm1024_vm5, %v1019_v47, %v2163_v4  ;;  %v1028_v36 = vsel %vm1024_vm5, %v1011_v44, %v2165_v48  ;;  %v540_v55 = vsel %vm262_vm0, %v1778_v15, %v539_v6  ;;  %v992_v4 = vsel %vm990_vm3, %v1765_v7, %v1990_v26  ;;  %v1521_v47 = vld [vmem:[%s1762_s16 + $0x78] sm:$0xff]  ;;  %v1534_v44 = vld [vmem:[%s1762_s16 + $0xe0] sm:$0xff] }
  0xdb   : >> { %v1000_v48 = vsel %vm990_vm3, %v1774_v13, %v2002_v31  ;;  %v1009_v17 = vsel %vm1007_vm4, %v992_v4, %v2032_v46 }
  0xdc   : >> { %918 = vrot.lane.b32.xlu1 %v558_v9, %s1675_s23  ;;  %902 = vrot.lane.b32.xlu0 %v1796_v24, %s1675_s23  ;;  %v1017_v28 = vsel %vm1007_vm4, %v1000_v48, %v2030_v45 }
  0xdd   : >> { %v1034_v7 = vsel %vm1024_vm5, %v1017_v28, %v2048_v51  ;;  %v1523_v28 = vld [vmem:[%s1762_s16 + $0x88] sm:$0x3] }
  0xde   : >> { %v959_v40 = vpop.permute.xlu1 %958  ;;  %v943_v54 = vpop.permute.xlu0 %942  ;;  %v1051_v46 = vsel %vm1041_vm6, %v1034_v7, %v2086_v25  ;;  %v434_v25 = vsel %vm262_vm0, %v2184_v42, %v433_v38  ;;  %v599_v42 = vrot.slane %v2236_v59, 2  ;;  %v544_v7 = vrot.slane %v1523_v28, 1 }
  0xdf   : >> { %v1118_v39 = vsel %vm1109_vm10, %v1101_v62, %v959_v40  ;;  %v1110_v33 = vsel %vm1109_vm10, %v1093_v56, %v943_v54  ;;  %v1068_v50 = vsel %vm1058_vm7, %v1051_v46, %v2118_v5  ;;  %v579_v56 = vrot.slane %v2241_v34, 2 }
  0xe0   : >> { %732 = vrot.lane.b32.xlu1 %v2168_v43, %s1671_s19  ;;  %1602 = vmatprep.mubr.msk.f32.mxu1 %vm1126_vm11, %v1118_v39  ;;  %v473_v40 = vrot.slane %v1509_v30, 2  ;;  %v601_v46 = vrot.slane %v1533_v12, 2 }
  0xe1   : >> { %716 = vrot.lane.b32.xlu0 %v1774_v13, %s1671_s19  ;;  %1590 = vmatprep.mubr.msk.f32.mxu0 %vm1126_vm11, %v1110_v33  ;;  %v1026_v13 = vsel %vm1024_vm5, %v1009_v17, %v2050_v52  ;;  %v1085_v52 = vsel %vm1075_vm8, %v1068_v50, %v2149_v16  ;;  %v580_v34 = vsel %vm303_vm1, %v1789_v21, %v579_v56 }
  0xe2   : >> { %v2250_v2 = vpop.permute.xlu1 %630  ;;  %v2252_v63 = vpop.permute.xlu0 %614  ;;  %v1043_v49 = vsel %vm1041_vm6, %v1026_v13, %v2088_v29  ;;  %v1102_v5 = vsel %vm1092_vm9, %v1085_v52, %v2214_v32 }
  0xe3   : >> { %v1060_v51 = vsel %vm1058_vm7, %v1043_v49, %v2120_v53  ;;  %v1003_v54 = vsel %vm990_vm3, %v1873_v10, %v2250_v2  ;;  %v995_v59 = vsel %vm990_vm3, %v1876_v11, %v2252_v63  ;;  %v474_v10 = vsel %vm303_vm1, %v2268_v60, %v473_v40 }
  0xe4   : >> { %778 = vrot.lane.b32.xlu1 %v558_v9, %s1672_s20  ;;  %v1497_v9 = vld [vmem:[%s1762_s16 + $0x70] sm:$0x3]  ;;  %v1077_v57 = vsel %vm1075_vm8, %v1060_v51, %v2151_v23  ;;  %v602_v49 = vrot.slane %v1534_v44, 2  ;;  %v581_v51 = vrot.slane %v1521_v47, 2 }
  0xe5   : >> { %762 = vrot.lane.b32.xlu0 %v1796_v24, %s1672_s20  ;;  %v413_v45 = vrot.slane %v1497_v9, 1  ;;  %v1094_v29 = vsel %vm1092_vm9, %v1077_v57, %v2216_v61 }
  0xe6   : >> { %v773_v8 = vpop.permute.xlu1 %772  ;;  %v757_v41 = vpop.permute.xlu0 %756 }
  0xe7   : >> { %v2282_v43 = vsel %vm1041_vm6, %v1036_v35, %v773_v8  ;;  %v2285_v24 = vsel %vm1041_vm6, %v1028_v36, %v757_v41  ;;  %v414_v16 = vsel %vm262_vm0, %v1778_v15, %v413_v45  ;;  %v600_v15 = vsel %vm303_vm1, %v2268_v60, %v599_v42  ;;  %v1522_v60 = vld [vmem:[%s1762_s16 + $0x80] sm:$0xff] }
  0xe8   : >> { %920 = vrot.lane.b32.xlu1 %v560_v0, %s1675_s23  ;;  %v561_v0 = vrot.slane %v1533_v12, 1  ;;  %v541_v8 = vrot.slane %v1521_v47, 1  ;;  %v542_v30 = vrot.slane %v1522_v60, 1  ;;  %v582_v52 = vrot.slane %v1522_v60, 2 }
  0xe9   : >> { %904 = vrot.lane.b32.xlu0 %v540_v55, %s1675_s23 }
  0xea   : >> { %v2306_v26 = vpop.permute.xlu1 %818  ;;  %v2308_v31 = vpop.permute.xlu0 %802 }
  0xec   : >> { %966 = vrot.lane.b32.xlu1 %v598_v37, %s1676_s24 }
  0xed   : >> { %950 = vrot.lane.b32.xlu0 %v1805_v27, %s1676_s24 }
  0xee   : >> { %v961_v53 = vpop.permute.xlu1 %960  ;;  %v945_v58 = vpop.permute.xlu0 %944 }
  0xef   : >> { %v1119_v62 = vsel %vm1109_vm10, %v1102_v5, %v961_v53  ;;  %v1111_v23 = vsel %vm1109_vm10, %v1094_v29, %v945_v58  ;;  %v545_v5 = vsel %vm262_vm0, %v542_v30, %v544_v7  ;;  %v603_v29 = vsel %vm303_vm1, %v601_v46, %v602_v49 }
  0xf0   : >> { %780 = vrot.lane.b32.xlu1 %v434_v25, %s1672_s20  ;;  %1603 = vmatmul.mubr.msk.f32.vlgmr.msra.gmra.mrb[0].mxu1 %vm1126_vm11, %v1119_v62  ;;  %v583_v62 = vsel %vm303_vm1, %v581_v51, %v582_v52 }
  0xf1   : >> { %764 = vrot.lane.b32.xlu0 %v414_v16, %s1672_s20  ;;  %1591 = vmatmul.mubr.msk.f32.vlgmr.msra.gmra.mrb[0].mxu0 %vm1126_vm11, %v1111_v23  ;;  %v584_v23 = vrot.slane %v1523_v28, 2 }
  0xf2   : >> { %v633_v32 = vpop.permute.xlu1 %632  ;;  %v617_v61 = vpop.permute.xlu0 %616 }
  0xf3   : >> { %v1004_v35 = vsel %vm990_vm3, %v1887_v19, %v633_v32  ;;  %v996_v36 = vsel %vm990_vm3, %v1890_v20, %v617_v61  ;;  %v543_v20 = vsel %vm262_vm0, %v541_v8, %v542_v30  ;;  %v585_v56 = vsel %vm303_vm1, %v582_v52, %v584_v23 }
  0xf4   : >> { %826 = vrot.lane.b32.xlu1 %v598_v37, %s1673_s21 }
  0xf5   : >> { %810 = vrot.lane.b32.xlu0 %v1805_v27, %s1673_s21  ;;  %v453_v27 = vrot.slane %v1497_v9, 2  ;;  %v1535_v9 = vld [vmem:[%s1762_s16 + $0xe8] sm:$0x3] }
  0xf6   : >> { %v679_v39 = vpop.permute.xlu1 %678  ;;  %v663_v33 = vpop.permute.xlu0 %662  ;;  %v564_v19 = vrot.slane %v1535_v9, 1  ;;  %v604_v53 = vrot.slane %v1535_v9, 2 }
  0xf7   : >> { %v1020_v1 = vsel %vm1007_vm4, %v1003_v54, %v679_v39  ;;  %v1012_v6 = vsel %vm1007_vm4, %v995_v59, %v663_v33  ;;  %v454_v63 = vsel %vm303_vm1, %v1789_v21, %v453_v27  ;;  %v562_v21 = vrot.slane %v1534_v44, 1 }
  0xf8   : >> { %968 = vrot.lane.b32.xlu1 %v600_v15, %s1676_s24  ;;  %v605_v42 = vsel %vm303_vm1, %v602_v49, %v604_v53 }
  0xf9   : >> { %952 = vrot.lane.b32.xlu0 %v580_v34, %s1676_s24  ;;  %v563_v17 = vsel %vm262_vm0, %v561_v0, %v562_v21  ;;  %v565_v50 = vsel %vm262_vm0, %v562_v21, %v564_v19 }
  0xfa   : >> { %v2360_v11 = vpop.permute.xlu1 %820  ;;  %v2362_v2 = vpop.permute.xlu0 %804 }
  0xfb   : >> { %v1070_v8 = vsel %vm1058_vm7, %v2282_v43, %v2360_v11  ;;  %v2616_v11 = vld [vmem:[#allocation9_spill] sm:$0xff] }
  0xfc   : >> { %828 = vrot.lane.b32.xlu1 %v474_v10, %s1673_s21 }
  0xfd   : >> { %812 = vrot.lane.b32.xlu0 %v454_v63, %s1673_s21 }
  0xfe   : >> { %v2369_v14 = vpop.permute.xlu1 %866  ;;  %v2371_v3 = vpop.permute.xlu0 %850 }
 0x100   : >> { %874 = vrot.lane.b32.xlu1 %v1533_v12, %s1674_s22 }
 0x101   : >> { %858 = vrot.lane.b32.xlu0 %v1521_v47, %s1674_s22 }
 0x102   : >> { %v681_v41 = vpop.permute.xlu1 %680  ;;  %v665_v55 = vpop.permute.xlu0 %664 }
 0x103   : >> { %v1021_v4 = vsel %vm1007_vm4, %v1004_v35, %v681_v41  ;;  %v1013_v48 = vsel %vm1007_vm4, %v996_v36, %v665_v55  ;;  %v1062_v41 = vsel %vm1058_vm7, %v2285_v24, %v2362_v2 }
 0x104   : >> { %876 = vrot.lane.b32.xlu1 %v1534_v44, %s1674_s22 }
 0x105   : >> { %860 = vrot.lane.b32.xlu0 %v1522_v60, %s1674_s22 }
 0x106   : >> { %v727_v37 = vpop.permute.xlu1 %726  ;;  %v711_v38 = vpop.permute.xlu0 %710 }
 0x107   : >> { %v1037_v13 = vsel %vm1024_vm5, %v1020_v1, %v727_v37  ;;  %v1029_v45 = vsel %vm1024_vm5, %v1012_v6, %v711_v38  ;;  %v1069_v1 = vsel %vm1058_vm7, %v2189_v22, %v2306_v26  ;;  %v1061_v6 = vsel %vm1058_vm7, %v2192_v18, %v2308_v31  ;;  %v2617_v37 = vld [vmem:[#allocation10_spill] sm:$0xff] }
 0x108   : >> { %922 = vrot.lane.b32.xlu1 %v563_v17, %s1675_s23  ;;  %v1086_v10 = vsel %vm1075_vm8, %v1069_v1, %v2369_v14  ;;  %v1078_v63 = vsel %vm1075_vm8, %v1061_v6, %v2371_v3 }
 0x109   : >> { %906 = vrot.lane.b32.xlu0 %v543_v20, %s1675_s23 }
 0x10a   : >> { %v869_v57 = vpop.permute.xlu1 %868  ;;  %v853_v25 = vpop.permute.xlu0 %852 }
 0x10b   : >> { %v1087_v55 = vsel %vm1075_vm8, %v1070_v8, %v869_v57  ;;  %v1079_v30 = vsel %vm1075_vm8, %v1062_v41, %v853_v25 }
 0x10c   : >> { %924 = vrot.lane.b32.xlu1 %v565_v50, %s1675_s23 }
 0x10d   : >> { %908 = vrot.lane.b32.xlu0 %v545_v5, %s1675_s23 }
 0x10e   : >> { %v915_v58 = vpop.permute.xlu1 %914  ;;  %v899_v16 = vpop.permute.xlu0 %898 }
 0x10f   : >> { %v1103_v12 = vsel %vm1092_vm9, %v1086_v10, %v915_v58  ;;  %v1095_v47 = vsel %vm1092_vm9, %v1078_v63, %v899_v16 }
 0x110   : >> { %970 = vrot.lane.b32.xlu1 %v603_v29, %s1676_s24 }
 0x111   : >> { %954 = vrot.lane.b32.xlu0 %v583_v62, %s1676_s24 }
 0x112   : >> { %v729_v32 = vpop.permute.xlu1 %728  ;;  %v713_v61 = vpop.permute.xlu0 %712 }
 0x113   : >> { %v1038_v15 = vsel %vm1024_vm5, %v1021_v4, %v729_v32  ;;  %v1030_v40 = vsel %vm1024_vm5, %v1013_v48, %v713_v61 }
 0x114   : >> { %972 = vrot.lane.b32.xlu1 %v605_v42, %s1676_s24 }
 0x115   : >> { %956 = vrot.lane.b32.xlu0 %v585_v56, %s1676_s24 }
 0x116   : >> { %v775_v54 = vpop.permute.xlu1 %774  ;;  %v759_v59 = vpop.permute.xlu0 %758 }
 0x117   : >> { %v2409_v39 = vsel %vm1041_vm6, %v1037_v13, %v775_v54  ;;  %v2412_v33 = vsel %vm1041_vm6, %v1029_v45, %v759_v59 }
 0x11a   : >> { %v917_v34 = vpop.permute.xlu1 %916  ;;  %v901_v27 = vpop.permute.xlu0 %900 }
 0x11b   : >> { %v1104_v9 = vsel %vm1092_vm9, %v1087_v55, %v917_v34  ;;  %v1096_v4 = vsel %vm1092_vm9, %v1079_v30, %v901_v27 }
 0x11e   : >> { %v963_v44 = vpop.permute.xlu1 %962  ;;  %v947_v60 = vpop.permute.xlu0 %946 }
 0x11f   : >> { %v1120_v0 = vsel %vm1109_vm10, %v1103_v12, %v963_v44  ;;  %v1112_v22 = vsel %vm1109_vm10, %v1095_v47, %v947_v60 }
 0x120   : >> { %1593 = vmatprep.mubr.msk.f32.mxu0 %vm1126_vm11, %v1112_v22  ;;  %1605 = vmatprep.mubr.msk.f32.mxu1 %vm1126_vm11, %v1120_v0 }
 0x122   : >> { %v635_v18 = vpop.permute.xlu1 %634  ;;  %v619_v26 = vpop.permute.xlu0 %618 }
 0x123   : >> { %v1005_v2 = vsel %vm990_vm3, %v2616_v11, %v635_v18  ;;  %v997_v38 = vsel %vm990_vm3, %v2617_v37, %v619_v26 }
 0x126   : >> { %v777_v31 = vpop.permute.xlu1 %776  ;;  %v761_v14 = vpop.permute.xlu0 %760 }
 0x127   : >> { %v1055_v3 = vsel %vm1041_vm6, %v1038_v15, %v777_v31  ;;  %v1047_v21 = vsel %vm1041_vm6, %v1030_v40, %v761_v14 }
 0x12a   : >> { %v823_v35 = vpop.permute.xlu1 %822  ;;  %v807_v36 = vpop.permute.xlu0 %806 }
 0x12b   : >> { %v1071_v15 = vsel %vm1058_vm7, %v2409_v39, %v823_v35  ;;  %v1063_v40 = vsel %vm1058_vm7, %v2412_v33, %v807_v36 }
 0x12e   : >> { %v965_v48 = vpop.permute.xlu1 %964  ;;  %v949_v28 = vpop.permute.xlu0 %948 }
 0x12f   : >> { %v1121_v17 = vsel %vm1109_vm10, %v1104_v9, %v965_v48  ;;  %v1113_v19 = vsel %vm1109_vm10, %v1096_v4, %v949_v28 }
 0x130   : >> { %1594 = vmatmul.mubr.msk.f32.gmra.mrb[2].mxu0 %vm1126_vm11, %v1113_v19  ;;  %1606 = vmatmul.mubr.msk.f32.gmra.mrb[2].mxu1 %vm1126_vm11, %v1121_v17 }
 0x132   : >> { %v2446_v43 = vpop.permute.xlu1 %636  ;;  %v2448_v24 = vpop.permute.xlu0 %620 }
 0x136   : >> { %v683_v20 = vpop.permute.xlu1 %682  ;;  %v667_v7 = vpop.permute.xlu0 %666 }
 0x137   : >> { %v1022_v13 = vsel %vm1007_vm4, %v1005_v2, %v683_v20  ;;  %v1014_v45 = vsel %vm1007_vm4, %v997_v38, %v667_v7  ;;  %v2618_v2 = vld [vmem:[#allocation11_spill] sm:$0xff]  ;;  %v2619_v7 = vld [vmem:[#allocation12_spill] sm:$0xff] }
 0x138   : >> { %v1006_v37 = vsel %vm990_vm3, %v2618_v2, %v2446_v43 }
 0x13a   : >> { %v825_v46 = vpop.permute.xlu1 %824  ;;  %v809_v49 = vpop.permute.xlu0 %808 }
 0x13b   : >> { %v1072_v44 = vsel %vm1058_vm7, %v1055_v3, %v825_v46  ;;  %v1064_v60 = vsel %vm1058_vm7, %v1047_v21, %v809_v49  ;;  %v998_v46 = vsel %vm990_vm3, %v2619_v7, %v2448_v24 }
 0x13e   : >> { %v871_v50 = vpop.permute.xlu1 %870  ;;  %v855_v51 = vpop.permute.xlu0 %854 }
 0x13f   : >> { %v1088_v54 = vsel %vm1075_vm8, %v1071_v15, %v871_v50  ;;  %v1080_v59 = vsel %vm1075_vm8, %v1063_v40, %v855_v51 }
 0x142   : >> { %v685_v52 = vpop.permute.xlu1 %684  ;;  %v669_v57 = vpop.permute.xlu0 %668 }
 0x143   : >> { %v1015_v50 = vsel %vm1007_vm4, %v998_v46, %v669_v57 }
 0x146   : >> { %v731_v25 = vpop.permute.xlu1 %730  ;;  %v715_v5 = vpop.permute.xlu0 %714 }
 0x147   : >> { %v1039_v48 = vsel %vm1024_vm5, %v1022_v13, %v731_v25  ;;  %v1031_v17 = vsel %vm1024_vm5, %v1014_v45, %v715_v5  ;;  %v1023_v13 = vsel %vm1007_vm4, %v1006_v37, %v685_v52 }
 0x14a   : >> { %v873_v29 = vpop.permute.xlu1 %872  ;;  %v857_v53 = vpop.permute.xlu0 %856 }
 0x14b   : >> { %v1089_v0 = vsel %vm1075_vm8, %v1072_v44, %v873_v29  ;;  %v1081_v22 = vsel %vm1075_vm8, %v1064_v60, %v857_v53 }
 0x14e   : >> { %v919_v58 = vpop.permute.xlu1 %918  ;;  %v903_v16 = vpop.permute.xlu0 %902 }
 0x14f   : >> { %v1105_v34 = vsel %vm1092_vm9, %v1088_v54, %v919_v58  ;;  %v1097_v1 = vsel %vm1092_vm9, %v1080_v59, %v903_v16 }
 0x152   : >> { %v733_v62 = vpop.permute.xlu1 %732 }
 0x153   : >> { %v717_v23 = vpop.permute.xlu0 %716  ;;  %v1040_v51 = vsel %vm1024_vm5, %v1023_v13, %v733_v62 }
 0x154   : >> { %v1032_v29 = vsel %vm1024_vm5, %v1015_v50, %v717_v23 }
 0x156   : >> { %v779_v42 = vpop.permute.xlu1 %778 }
 0x157   : >> { %v763_v32 = vpop.permute.xlu0 %762  ;;  %v1056_v19 = vsel %vm1041_vm6, %v1039_v48, %v779_v42 }
 0x158   : >> { %v1048_v38 = vsel %vm1041_vm6, %v1031_v17, %v763_v32 }
 0x15a   : >> { %v921_v61 = vpop.permute.xlu1 %920 }
 0x15b   : >> { %v905_v56 = vpop.permute.xlu0 %904  ;;  %v1106_v18 = vsel %vm1092_vm9, %v1089_v0, %v921_v61  ;;  %v2621_v0 = vld [vmem:[#allocation8_spill] sm:$0xff] }
 0x15c   : >> { %v1098_v31 = vsel %vm1092_vm9, %v1081_v22, %v905_v56 }
 0x15e   : >> { %v967_v27 = vpop.permute.xlu1 %966 }
 0x15f   : >> { %v1122_v6 = vsel %vm1109_vm10, %v1105_v34, %v967_v27  ;;  %v951_v10 = vpop.permute.xlu0 %950 }
 0x160   : >> { %v1114_v63 = vsel %vm1109_vm10, %v1097_v1, %v951_v10  ;;  %1608 = vmatprep.mubr.msk.f32.mxu1 %vm1126_vm11, %v1122_v6 }
 0x161   : >> { %1596 = vmatprep.mubr.msk.f32.mxu0 %vm1126_vm11, %v1114_v63 }
 0x162   : >> { %v781_v39 = vpop.permute.xlu1 %780 }
 0x163   : >> { %v765_v33 = vpop.permute.xlu0 %764  ;;  %v1057_v53 = vsel %vm1041_vm6, %v1040_v51, %v781_v39 }
 0x164   : >> { %v1049_v16 = vsel %vm1041_vm6, %v1032_v29, %v765_v33  ;;  %v2620_v33 = vld [vmem:[#allocation7_spill] sm:$0xff] }
 0x166   : >> { %v827_v12 = vpop.permute.xlu1 %826 }
 0x167   : >> { %v811_v47 = vpop.permute.xlu0 %810  ;;  %v1073_v20 = vsel %vm1058_vm7, %v1056_v19, %v827_v12 }
 0x168   : >> { %v1065_v49 = vsel %vm1058_vm7, %v1048_v38, %v811_v47 }
 0x16a   : >> { %v969_v26 = vpop.permute.xlu1 %968 }
 0x16b   : >> { %v1123_v14 = vsel %vm1109_vm10, %v1106_v18, %v969_v26  ;;  %v953_v35 = vpop.permute.xlu0 %952 }
 0x16c   : >> { %v1115_v36 = vsel %vm1109_vm10, %v1098_v31, %v953_v35  ;;  %1609 = vmatmul.mubr.msk.f32.gmra.mrb[4].mxu1 %vm1126_vm11, %v1123_v14 }
 0x16d   : >> { %1597 = vmatmul.mubr.msk.f32.gmra.mrb[4].mxu0 %vm1126_vm11, %v1115_v36 }
 0x16e   : >> { %v829_v3 = vpop.permute.xlu1 %828 }
 0x16f   : >> { %v813_v21 = vpop.permute.xlu0 %812  ;;  %v1074_v57 = vsel %vm1058_vm7, %v1057_v53, %v829_v3 }
 0x170   : >> { %v1066_v42 = vsel %vm1058_vm7, %v1049_v16, %v813_v21 }
 0x172   : >> { %v875_v8 = vpop.permute.xlu1 %874 }
 0x173   : >> { %v859_v41 = vpop.permute.xlu0 %858  ;;  %v1090_v45 = vsel %vm1075_vm8, %v1073_v20, %v875_v8 }
 0x174   : >> { %v1082_v43 = vsel %vm1075_vm8, %v1065_v49, %v859_v41 }
 0x176   : >> { %v877_v55 = vpop.permute.xlu1 %876 }
 0x177   : >> { %v861_v30 = vpop.permute.xlu0 %860  ;;  %v1091_v23 = vsel %vm1075_vm8, %v1074_v57, %v877_v55 }
 0x178   : >> { %v1083_v32 = vsel %vm1075_vm8, %v1066_v42, %v861_v30 }
 0x17a   : >> { %v923_v9 = vpop.permute.xlu1 %922 }
 0x17b   : >> { %v907_v4 = vpop.permute.xlu0 %906  ;;  %v1107_v25 = vsel %vm1092_vm9, %v1090_v45, %v923_v9 }
 0x17c   : >> { %v1099_v24 = vsel %vm1092_vm9, %v1082_v43, %v907_v4 }
 0x17e   : >> { %v925_v28 = vpop.permute.xlu1 %924 }
 0x17f   : >> { %v909_v11 = vpop.permute.xlu0 %908  ;;  %v1108_v61 = vsel %vm1092_vm9, %v1091_v23, %v925_v28 }
 0x180   : >> { %v1100_v15 = vsel %vm1092_vm9, %v1083_v32, %v909_v11 }
 0x182   : >> { %v971_v5 = vpop.permute.xlu1 %970 }
 0x183   : >> { %v1124_v52 = vsel %vm1109_vm10, %v1107_v25, %v971_v5  ;;  %v955_v58 = vpop.permute.xlu0 %954 }
 0x184   : >> { %v1116_v62 = vsel %vm1109_vm10, %v1099_v24, %v955_v58  ;;  %1611 = vmatprep.mubr.msk.f32.mxu1 %vm1126_vm11, %v1124_v52 }
 0x185   : >> { %1599 = vmatprep.mubr.msk.f32.mxu0 %vm1126_vm11, %v1116_v62 }
 0x186   : >> { %v973_v56 = vpop.permute.xlu1 %972 }
 0x187   : >> { %v1125_v40 = vsel %vm1109_vm10, %v1108_v61, %v973_v56  ;;  %v957_v54 = vpop.permute.xlu0 %956 }
 0x188   : >> { %v1117_v59 = vsel %vm1109_vm10, %v1100_v15, %v957_v54  ;;  %1612 = vmatmul.mubr.msk.f32.gmra.mrb[6].mxu1 %vm1126_vm11, %v1125_v40 }
 0x189   : >> { %1600 = vmatmul.mubr.msk.f32.gmra.mrb[6].mxu0 %vm1126_vm11, %v1117_v59 }
 0x1c3   : >> { %v1604_v34 = vpop.f32.mrb[0].mxu1 }
 0x1c4   : >> { %v1592_v27 = vpop.f32.mrb[0].mxu0  ;;  %v1333_v1 = vmax.f32 %v1604_v34, 0.0  ;;  %v1285_v6 = vpop.f32.mrb[1].mxu1 }
 0x1c5   : >> { %v1325_v10 = vmax.f32 %v1592_v27, 0.0  ;;  %v1245_v63 = vpop.f32.mrb[1].mxu0  ;;  %v1332_v39 = vmax.f32 %v1285_v6, 0.0 }
 0x1c6   : >> { %v1355_v12 = vmul.f32 %v2620_v33, %v1333_v1  ;;  %v1324_v47 = vmax.f32 %v1245_v63, 0.0 }
 0x1c7   : >> { %v1347_v44 = vmul.f32 %v2620_v33, %v1325_v10  ;;  %v1354_v60 = vmul.f32 %v2620_v33, %v1332_v39 }
 0x1c8   : >> { %v1377_v22 = vadd.f32 %v2621_v0, %v1355_v12  ;;  %v1346_v18 = vmul.f32 %v2620_v33, %v1324_v47 }
 0x1c9   : >> { %v1369_v26 = vadd.f32 %v2621_v0, %v1347_v44  ;;  %v1376_v31 = vadd.f32 %v2621_v0, %v1354_v60 }
 0x1ca   : >> { %1395 = vst.msk [vmem:[%s2518_s26 + $0x48] sm:$0xff] %vm1007_vm4, %v1377_v22  ;;  %v1368_v14 = vadd.f32 %v2621_v0, %v1346_v18 }
 0x1cb   : >> { %1387 = vst.msk [vmem:[%s2518_s26 + $0x8] sm:$0xff] %vm1007_vm4, %v1369_v26  ;;  %1394 = vst.msk [vmem:[%s2518_s26 + $0x40] sm:$0xff] %vm1007_vm4, %v1376_v31 }
 0x1cc   : >> { %1386 = vst.msk [vmem:[%s2518_s26] sm:$0xff] %vm1007_vm4, %v1368_v14 }
 0x203   : >> { %v1595_v35 = vpop.f32.mrb[2].mxu0  ;;  %v1607_v36 = vpop.f32.mrb[2].mxu1 }
 0x204   : >> { %v1327_v3 = vmax.f32 %v1595_v35, 0.0  ;;  %v1335_v21 = vmax.f32 %v1607_v36, 0.0  ;;  %v1255_v8 = vpop.f32.mrb[3].mxu0  ;;  %v1295_v41 = vpop.f32.mrb[3].mxu1 }
 0x205   : >> { %v1326_v55 = vmax.f32 %v1255_v8, 0.0  ;;  %v1334_v30 = vmax.f32 %v1295_v41, 0.0 }
 0x206   : >> { %v1349_v9 = vmul.f32 %v2620_v33, %v1327_v3  ;;  %v1357_v4 = vmul.f32 %v2620_v33, %v1335_v21 }
 0x207   : >> { %v1348_v48 = vmul.f32 %v2620_v33, %v1326_v55  ;;  %v1356_v28 = vmul.f32 %v2620_v33, %v1334_v30 }
 0x208   : >> { %v1371_v17 = vadd.f32 %v2621_v0, %v1349_v9  ;;  %v1379_v19 = vadd.f32 %v2621_v0, %v1357_v4 }
 0x209   : >> { %v1370_v11 = vadd.f32 %v2621_v0, %v1348_v48  ;;  %v1378_v2 = vadd.f32 %v2621_v0, %v1356_v28 }
 0x20a   : >> { %1389 = vst.msk [vmem:[%s2518_s26 + $0x18] sm:$0xff] %vm1007_vm4, %v1371_v17  ;;  %1397 = vst.msk [vmem:[%s2518_s26 + $0x58] sm:$0xff] %vm1007_vm4, %v1379_v19 }
 0x20b   : >> { %1388 = vst.msk [vmem:[%s2518_s26 + $0x10] sm:$0xff] %vm1007_vm4, %v1370_v11  ;;  %1396 = vst.msk [vmem:[%s2518_s26 + $0x50] sm:$0xff] %vm1007_vm4, %v1378_v2 }
 0x23f   : >> { %v1610_v37 = vpop.f32.mrb[4].mxu1 }
 0x240   : >> { %v1598_v38 = vpop.f32.mrb[4].mxu0  ;;  %v1337_v20 = vmax.f32 %v1610_v37, 0.0  ;;  %v1305_v7 = vpop.f32.mrb[5].mxu1 }
 0x241   : >> { %v1329_v46 = vmax.f32 %v1598_v38, 0.0  ;;  %v1265_v13 = vpop.f32.mrb[5].mxu0  ;;  %v1336_v49 = vmax.f32 %v1305_v7, 0.0 }
 0x242   : >> { %v1359_v45 = vmul.f32 %v2620_v33, %v1337_v20  ;;  %v1328_v50 = vmax.f32 %v1265_v13, 0.0 }
 0x243   : >> { %v1351_v51 = vmul.f32 %v2620_v33, %v1329_v46  ;;  %v1358_v43 = vmul.f32 %v2620_v33, %v1336_v49 }
 0x244   : >> { %v1381_v25 = vadd.f32 %v2621_v0, %v1359_v45  ;;  %v1350_v5 = vmul.f32 %v2620_v33, %v1328_v50 }
 0x245   : >> { %v1373_v29 = vadd.f32 %v2621_v0, %v1351_v51  ;;  %v1380_v53 = vadd.f32 %v2621_v0, %v1358_v43 }
 0x246   : >> { %1399 = vst.msk [vmem:[%s2518_s26 + $0x68] sm:$0xff] %vm1007_vm4, %v1381_v25  ;;  %v1372_v24 = vadd.f32 %v2621_v0, %v1350_v5 }
 0x247   : >> { %1391 = vst.msk [vmem:[%s2518_s26 + $0x28] sm:$0xff] %vm1007_vm4, %v1373_v29  ;;  %1398 = vst.msk [vmem:[%s2518_s26 + $0x60] sm:$0xff] %vm1007_vm4, %v1380_v53 }
 0x248   : >> { %1390 = vst.msk [vmem:[%s2518_s26 + $0x20] sm:$0xff] %vm1007_vm4, %v1372_v24 }
 0x25b   : >> { %v1613_v52 = vpop.f32.mrb[6].mxu1 }
 0x25c   : >> { %v1601_v58 = vpop.f32.mrb[6].mxu0  ;;  %v1339_v16 = vmax.f32 %v1613_v52, 0.0  ;;  %v1315_v57 = vpop.f32.mrb[7].mxu1 }
 0x25d   : >> { %v1331_v62 = vmax.f32 %v1601_v58, 0.0  ;;  %v1275_v42 = vpop.f32.mrb[7].mxu0  ;;  %v1338_v23 = vmax.f32 %v1315_v57, 0.0 }
 0x25e   : >> { %v1361_v32 = vmul.f32 %v2620_v33, %v1339_v16  ;;  %v1330_v61 = vmax.f32 %v1275_v42, 0.0  ;;  %209 = sbr.rel (!%p207_p4) target bundleno = 17 (0x11), region = 77 }
 0x25f   : >> { %v1353_v56 = vmul.f32 %v2620_v33, %v1331_v62  ;;  %v1360_v15 = vmul.f32 %v2620_v33, %v1338_v23 }
 0x260   : >> { %v1383_v40 = vadd.f32 %v2621_v0, %v1361_v32  ;;  %v1352_v54 = vmul.f32 %v2620_v33, %v1330_v61 }
 0x261   : >> { %v1375_v59 = vadd.f32 %v2621_v0, %v1353_v56  ;;  %v1382_v34 = vadd.f32 %v2621_v0, %v1360_v15 }
 0x262   : >> { %1401 = vst.msk [vmem:[%s2518_s26 + $0x78] sm:$0xff] %vm1007_vm4, %v1383_v40  ;;  %v1374_v27 = vadd.f32 %v2621_v0, %v1352_v54 }
 0x263   : >> { %1393 = vst.msk [vmem:[%s2518_s26 + $0x38] sm:$0xff] %vm1007_vm4, %v1375_v59  ;;  %1400 = vst.msk [vmem:[%s2518_s26 + $0x70] sm:$0xff] %vm1007_vm4, %v1382_v34 }
 0x264   : >> { %1392 = vst.msk [vmem:[%s2518_s26 + $0x30] sm:$0xff] %vm1007_vm4, %v1374_v27 }
 0x265 PF: > { %s14_s15 = sadd.s32 1, %s1663_s15  }
 0x266   : > { %p11_p5 = scmp.ge.s32.totalorder %s14_s15, 4  }
 0x268   :  { %13 = sbr.rel (!%p11_p5) target bundleno = 1 (0x1), region = 88 }

</bundles_post_ra>
